<compile_context>
chip_gen: v7x
topology: tpu7x:2x2x1
jax: 0.10.0
libtpu: 0.0.40
codegen_flags: <defaults>
</compile_context>

<pallas_src>
import math
import numpy as np
import jax
import jax.numpy as jnp
from jax.experimental import pallas as pl
from jax.experimental.pallas import tpu as pltpu

INPUT_DIM = 16     # transformer embedding dim
HEADS = 4
DIM_HEAD = 4
LAYERS = 4
FF_MULT = 4
BOTTLEN = 9        # number of correlation channels (levels)
LN_EPS = 1e-5
SCALE = DIM_HEAD ** -0.5
HIDDEN = INPUT_DIM * FF_MULT          # 64
FF_CHUNK = HIDDEN // 2                # FF hidden computed in 2 chunks of 32 rows

# row layout of the packed per-layer weight matrix Wbig (160, 16); offsets are 8-aligned
_WQ, _WK, _WV = 0, 16, 32
_WQL, _WKL = 48, 56                   # padded to 8 rows each (only 4 used)
_WRB, _WO, _W1 = 64, 80, 96
WBIG_ROWS = 160

# column layout of the packed model-level constant matrix "misc" (16, 36)
_ROT, _EREP, _WEMB, _BEMB, _WORIG, _BORIG = 0, 16, 24, 33, 34, 35
MISC_COLS = 36


# ----------------------------------------------------------------------------- helpers
def _ln_cols(x, w, b):
    # LayerNorm over the embedding axis (axis 0 / sublanes); w, b are (D, 1) columns.
    mu = jnp.mean(x, axis=0, keepdims=True)
    var = jnp.mean((x - mu) ** 2, axis=0, keepdims=True)
    return (x - mu) * jax.lax.rsqrt(var + LN_EPS) * w + b


def _softmax_lanes(x):
    # softmax over the sequence axis (axis 1 / lanes)
    m = jnp.max(x, axis=1, keepdims=True)
    e = jnp.exp(x - m)
    return e * (1.0 / jnp.sum(e, axis=1, keepdims=True))


def _gelu_exact(x):
    # erf via Abramowitz-Stegun 7.1.26 (|err| < 1.5e-7): matches nn.GELU() exact mode.
    a1, a2, a3, a4, a5 = 0.254829592, -0.284496736, 1.421413741, -1.453152027, 1.061405429
    p = 0.3275911
    z = x * (1.0 / math.sqrt(2.0))
    s = jnp.where(z < 0.0, -1.0, 1.0)
    az = jnp.abs(z)
    t = 1.0 / (1.0 + p * az)
    poly = t * (a1 + t * (a2 + t * (a3 + t * (a4 + t * a5))))
    erf = s * (1.0 - poly * jnp.exp(-az * az))
    return 0.5 * x * (1.0 + erf)


# ----------------------------------------------------------------------------- kernels
def _corr_kernel(src_ref, trg_ref, o_ref):
    # Geometry.cosine_similarity + ReLU; all L levels of one batch element per grid step.
    L = src_ref.shape[0]
    for l in range(L):                                   # static unroll (L = 9)
        s = src_ref[l].astype(jnp.float32)               # (N1, C)
        t = trg_ref[l].astype(jnp.float32)               # (C, N2)
        s = s / jnp.maximum(jnp.sqrt(jnp.sum(s * s, axis=1, keepdims=True)), 1e-12)
        t = t / jnp.maximum(jnp.sqrt(jnp.sum(t * t, axis=0, keepdims=True)), 1e-12)
        c = jnp.dot(s, t, preferred_element_type=jnp.float32)
        o_ref[l] = jnp.maximum(c, 0.0)


def _fused_kernel(corr_ref, cossin_ref, misc_ref, wbig_ref, w2t_ref, bias_ref, b1_ref, o_ref):
    # to_embedding -> LAYERS x (x + PreNorm(FastAttention)(x); x + PreNorm(FF)(x)) -> to_original
    # Layout: activations are (D, n) with the sequence n on the lane axis (lane-dense).
    D = INPUT_DIM
    f32 = jnp.float32

    # model-level constants
    rot = misc_ref[:, _ROT:_ROT + D]                     # (16,16): rot @ t == rotate_half(t)
    erep = misc_ref[:, _EREP:_EREP + 8]                  # (16, 8): head-scalar -> head dims (cols 4:8 zero)
    wemb = misc_ref[:, _WEMB:_WEMB + BOTTLEN]            # (16, 9)  to_embedding weight
    bemb = misc_ref[:, _BEMB:_BEMB + 1]                  # (16, 1)
    worig = misc_ref[:, _WORIG:_WORIG + 1]               # (16, 1)  to_original weight
    borig = misc_ref[0:1, _BORIG:_BORIG + 1]             # (1, 1)
    cos = cossin_ref[0:D, :]                             # (16, n)
    sin = cossin_ref[D:2 * D, :]

    # to_embedding: x (D, n) = Wemb @ corr (L, n) + b
    x = jnp.dot(wemb, corr_ref[...].astype(f32), preferred_element_type=f32) + bemb

    for l in range(LAYERS):                              # static unroll (LAYERS = 4)
        ln1w = bias_ref[l, :, 0:1]; ln1b = bias_ref[l, :, 1:2]
        ln2w = bias_ref[l, :, 2:3]; ln2b = bias_ref[l, :, 3:4]
        brb = bias_ref[l, :, 4:5]; bo = bias_ref[l, :, 5:6]; b2 = bias_ref[l, :, 6:7]

        # ---- x + PreNorm(FastAttention)(x) ----
        xn = _ln_cols(x, ln1w, ln1b)
        q = jnp.dot(wbig_ref[l, _WQ:_WQ + D, :], xn, preferred_element_type=f32)
        k = jnp.dot(wbig_ref[l, _WK:_WK + D, :], xn, preferred_element_type=f32)
        v = jnp.dot(wbig_ref[l, _WV:_WV + D, :], xn, preferred_element_type=f32)

        # rotary: t*cos + rotate_half(t)*sin  (rotate_half as a tiny 16x16 matmul)
        q_rot = q * cos + jnp.dot(rot, q, preferred_element_type=f32) * sin
        k_rot = k * cos + jnp.dot(rot, k, preferred_element_type=f32) * sin

        # q attention: softmax over the sequence, per head (logit rows 4..7 are zero padding)
        q_logits = jnp.dot(wbig_ref[l, _WQL:_WQL + 8, :], q, preferred_element_type=f32) * SCALE
        qa = jnp.dot(erep, _softmax_lanes(q_logits), preferred_element_type=f32)   # (16, n)
        global_q = jnp.sum(qa * q_rot, axis=1, keepdims=True)                      # (16, 1)

        # k attention: the '(d r) -> d' pair-sum is folded into Wkl
        kg = k * global_q
        k_logits = jnp.dot(wbig_ref[l, _WKL:_WKL + 8, :], kg, preferred_element_type=f32) * SCALE
        ka = jnp.dot(erep, _softmax_lanes(k_logits), preferred_element_type=f32)
        global_k = jnp.sum(ka * k_rot, axis=1, keepdims=True)

        # to_r (pair-sum folded into Wrb), residual with q, to_out
        # ('b h n d -> b n (h d)' is the identity in this packed-head layout)
        u = v * global_k
        r = jnp.dot(wbig_ref[l, _WRB:_WRB + D, :], u, preferred_element_type=f32) + brb + q
        x = x + jnp.dot(wbig_ref[l, _WO:_WO + D, :], r, preferred_element_type=f32) + bo

        # ---- x + PreNorm(FeedForward)(x): Linear -> GELU(exact) -> Linear ----
        xn2 = _ln_cols(x, ln2w, ln2b)
        ff = jnp.zeros_like(x)
        for c in range(HIDDEN // FF_CHUNK):              # hidden computed in chunks to bound VMEM
            r0 = _W1 + c * FF_CHUNK
            h = jnp.dot(wbig_ref[l, r0:r0 + FF_CHUNK, :], xn2, preferred_element_type=f32)
            h = _gelu_exact(h + b1_ref[l, c * FF_CHUNK:(c + 1) * FF_CHUNK, :])
            ff = ff + jnp.dot(w2t_ref[l, :, c * FF_CHUNK:(c + 1) * FF_CHUNK], h,
                              preferred_element_type=f32)
        x = x + ff + b2

    # to_original Linear(16,1): emit a lane-dense (1, n) output
    o_ref[...] = jnp.sum(worig * x, axis=0, keepdims=True) + borig


# ----------------------------------------------------------------------------- wrappers
def cosine_correlation(src, trg):
    # src, trg: (B, L, C, H, W)  ->  relu(cosine_sim) correlations (B, L, H*W, H*W)
    B, L, C, H, W = src.shape
    N = H * W
    src_f = src.reshape(B, L, C, N).transpose(0, 1, 3, 2)   # (B, L, N, C)
    trg_f = trg.reshape(B, L, C, N)                         # (B, L, C, N)
    return pl.pallas_call(
        _corr_kernel,
        out_shape=jax.ShapeDtypeStruct((B, L, N, N), jnp.float32),
        grid=(B,),
        in_specs=[pl.BlockSpec((None, L, N, C), lambda b: (b, 0, 0, 0)),
                  pl.BlockSpec((None, L, C, N), lambda b: (b, 0, 0, 0))],
        out_specs=pl.BlockSpec((None, L, N, N), lambda b: (b, 0, 0, 0)),
        compiler_params=pltpu.CompilerParams(
            dimension_semantics=("parallel",),
            vmem_limit_bytes=48 * 1024 * 1024),
    )(src_f, trg_f)


def fused_transformer(corr_flat, cossin, params):
    # corr_flat: (B, L, n)  ->  refined corr (B, n) = to_original(transformer(to_embedding(corr)))
    B, L, n = corr_flat.shape
    D = INPUT_DIM
    out = pl.pallas_call(
        _fused_kernel,
        out_shape=jax.ShapeDtypeStruct((B, 1, n), jnp.float32),
        grid=(B,),
        in_specs=[
            pl.BlockSpec((None, L, n), lambda b: (b, 0, 0)),             # correlations
            pl.BlockSpec((2 * D, n), lambda b: (0, 0)),                  # cos/sin (shared)
            pl.BlockSpec((D, MISC_COLS), lambda b: (0, 0)),              # packed constants
            pl.BlockSpec((LAYERS, WBIG_ROWS, D), lambda b: (0, 0, 0)),   # packed layer matrices
            pl.BlockSpec((LAYERS, D, HIDDEN), lambda b: (0, 0, 0)),      # FF second weights
            pl.BlockSpec((LAYERS, D, 8), lambda b: (0, 0, 0)),           # packed (D,)-biases
            pl.BlockSpec((LAYERS, HIDDEN, 1), lambda b: (0, 0, 0)),      # FF first bias
        ],
        out_specs=pl.BlockSpec((None, 1, n), lambda b: (b, 0, 0)),
        compiler_params=pltpu.CompilerParams(
            dimension_semantics=("parallel",),
            vmem_limit_bytes=48 * 1024 * 1024),
    )(corr_flat, cossin, params["misc"], params["wbig"], params["w2t"],
      params["biasp"], params["b1p"])
    return out[:, 0, :]


# ----------------------------------------------------------------------------- params / constants
def attn_constants(n):
    # RotaryEmbedding(dim=4, freqs_for='pixel'): freqs = linspace(1, max_freq/2, dim//2)*pi.
    # The reference FastAttention feeds flat positions arange(n) (see its forward), so we do too.
    D, H, Dh = INPUT_DIM, HEADS, DIM_HEAD
    base = np.linspace(1.0, 10.0 / 2.0, Dh // 2).astype(np.float64) * np.pi
    pos = np.arange(n, dtype=np.float64)
    ang = pos[None, :] * base[:, None]                 # (2, n)
    ang = np.repeat(ang, 2, axis=0)                    # (4, n): rows f0,f0,f1,f1
    ang = np.tile(ang, (H, 1))                         # (16, n): same freqs for every head
    cossin = np.concatenate([np.cos(ang), np.sin(ang)], axis=0).astype(np.float32)
    return jnp.asarray(cossin)                         # (2*D, n)


def init_params(key):
    D, H, Dh = INPUT_DIM, HEADS, DIM_HEAD
    keys = iter(jax.random.split(key, 64))

    def nrm(shape, s=0.05):
        return np.asarray(jax.random.normal(next(keys), shape, jnp.float32)) * s

    # ---- model-level constants packed into misc (D, 36) ----
    rot = np.zeros((D, D), np.float32)                 # rot @ t == rotate_half(t) (column layout)
    for j in range(D // 2):
        rot[2 * j, 2 * j + 1] = -1.0
        rot[2 * j + 1, 2 * j] = 1.0
    erep = np.zeros((D, 8), np.float32)                # per-head scalar -> head dims (padded to 8)
    for h in range(H):
        erep[h * Dh:(h + 1) * Dh, h] = 1.0
    misc = np.zeros((D, MISC_COLS), np.float32)
    misc[:, _ROT:_ROT + D] = rot
    misc[:, _EREP:_EREP + 8] = erep
    misc[:, _WEMB:_WEMB + BOTTLEN] = nrm((D, BOTTLEN))     # to_embedding Linear(9,16) weight
    misc[:, _BEMB] = nrm((D,))                             # to_embedding bias
    misc[:, _WORIG] = nrm((D,))                            # to_original Linear(16,1) weight
    misc[:, _BORIG] = float(nrm((1,))[0])                  # to_original bias (broadcast column)

    # ---- per-layer weights packed into stacked (LAYERS, ...) arrays ----
    wbig = np.zeros((LAYERS, WBIG_ROWS, D), np.float32)
    w2t = np.zeros((LAYERS, D, HIDDEN), np.float32)
    biasp = np.zeros((LAYERS, D, 8), np.float32)
    b1p = np.zeros((LAYERS, HIDDEN, 1), np.float32)
    for li in range(LAYERS):
        wbig[li, _WQ:_WQ + 3 * D] = nrm((3 * D, D))        # to_qkv weight (out,in), bias=False
        wq_head = nrm((Dh,))                               # to_q_attn_logits: Linear(4,1,bias=False)
        wk_head = nrm((Dh // 2,))                          # to_k_attn_logits: Linear(2,1,bias=False)
        wr = nrm((Dh, Dh // 2))                            # to_r: Linear(2,4) weight (out,in)
        br = nrm((Dh,))                                    # to_r bias
        for h in range(H):
            for j in range(Dh):
                wbig[li, _WQL + h, h * Dh + j] = wq_head[j]
            for j in range(Dh // 2):                       # '(d r)->d' pair-sum folded into Wkl
                wbig[li, _WKL + h, h * Dh + 2 * j] = wk_head[j]
                wbig[li, _WKL + h, h * Dh + 2 * j + 1] = wk_head[j]
            for i in range(Dh):                            # pair-sum folded into Wrb
                for j in range(Dh // 2):
                    wbig[li, _WRB + h * Dh + i, h * Dh + 2 * j] = wr[i, j]
                    wbig[li, _WRB + h * Dh + i, h * Dh + 2 * j + 1] = wr[i, j]
                biasp[li, h * Dh + i, 4] = br[i]           # brb
        wbig[li, _WO:_WO + D] = nrm((D, D))                # to_out weight (out,in)
        wbig[li, _W1:_W1 + HIDDEN] = nrm((HIDDEN, D))      # FF Linear(16,64) weight
        w2t[li] = nrm((D, HIDDEN))                         # FF Linear(64,16) weight
        biasp[li, :, 0] = 1.0                              # ln1 weight  (ln1 bias = col 1 = 0)
        biasp[li, :, 2] = 1.0                              # ln2 weight  (ln2 bias = col 3 = 0)
        biasp[li, :, 5] = nrm((D,))                        # to_out bias
        biasp[li, :, 6] = nrm((D,))                        # FF second bias
        b1p[li, :, 0] = nrm((HIDDEN,))                     # FF first bias
    return dict(misc=jnp.asarray(misc), wbig=jnp.asarray(wbig), w2t=jnp.asarray(w2t),
                biasp=jnp.asarray(biasp), b1p=jnp.asarray(b1p))


# ----------------------------------------------------------------------------- glue: interpolate4d
def _interp_matrix(S, T):
    M = np.zeros((T, S), np.float32)
    if S == 1 or T == 1:
        M[:, 0] = 1.0
        return jnp.asarray(M)
    for t in range(T):
        c = t * (S - 1) / (T - 1)            # align_corners=True
        i0 = int(np.floor(c))
        i1 = min(i0 + 1, S - 1)
        w = c - i0
        M[t, i0] += 1.0 - w
        M[t, i1] += w
    return jnp.asarray(M)


def interpolate4d(x, size):
    # x: (B, H1, W1, H2, W2) -> bilinear (align_corners=True) over both 2D pairs.
    B, H1, W1, H2, W2 = x.shape
    Mh1, Mw1 = _interp_matrix(H1, size[0]), _interp_matrix(W1, size[1])
    Mh2, Mw2 = _interp_matrix(H2, size[0]), _interp_matrix(W2, size[1])
    y = jnp.einsum("AI,BJ,bIJKL->bABKL", Mh1, Mw1, x)
    y = jnp.einsum("CK,DL,bABKL->bABCD", Mh2, Mw2, y)
    return y


# ----------------------------------------------------------------------------- full forward
def match2match_forward(src_feats, trg_feats, params, H1, W1, H2, W2):
    B = src_feats.shape[0]
    corr = cosine_correlation(src_feats, trg_feats)            # (B, L, N1, N2), relu applied
    _, L, N1, N2 = corr.shape
    n = N1 * N2
    corr_flat = corr.reshape(B, L, n)                          # contiguous -> free reshape
    cossin = attn_constants(n)
    refined = fused_transformer(corr_flat, cossin, params)     # (B, n)
    refined = refined.reshape(B, H1, W1, H2, W2)

    # TODO(synk): Geometry.interpolate4d's target size is set outside this module; a fixed
    # 2x bilinear (align_corners=True) upsample of both spatial pairs is assumed here.
    hf, wf = 2 * H1, 2 * W1
    up = interpolate4d(refined, (hf, wf))                      # (B, hf, wf, hf, wf)
    return up.reshape(B, hf * wf, hf * wf)


# ----------------------------------------------------------------------------- main
if __name__ == "__main__":
    key = jax.random.PRNGKey(0)
    # small test shapes: 9 feature levels (required by Linear(9,16)), C=8 channels,
    # 4x4 spatial (the real module uses 12x16 -> seq 36864; shrunk for the test).
    B, L, C, Hs, Ws = 2, BOTTLEN, 8, 4, 4
    k1, k2, k3 = jax.random.split(key, 3)
    src_feats = jax.random.normal(k1, (B, L, C, Hs, Ws), jnp.float32)
    trg_feats = jax.random.normal(k2, (B, L, C, Hs, Ws), jnp.float32)
    params = init_params(k3)

    out = match2match_forward(src_feats, trg_feats, params, Hs, Ws, Hs, Ws)
    out = jax.block_until_ready(out)
    assert out.shape == (B, (2 * Hs) * (2 * Ws), (2 * Hs) * (2 * Ws))
    assert bool(jnp.all(jnp.isfinite(out)))
    print("KERNEL_OK")
</pallas_src>

<mosaic_0001>
module attributes {stable_mosaic.version = 11 : i64} {
  func.func @_corr_kernel(%arg0: i32, %arg1: memref<1x9x16x8xf32, #tpu.memory_space<vmem>>, %arg2: memref<1x9x8x16xf32, #tpu.memory_space<vmem>>, %arg3: memref<1x9x16x16xf32, #tpu.memory_space<vmem>>) attributes {dimension_semantics = [#tpu.dimension_semantics<parallel>], iteration_bounds = array<i64: 2>, scalar_prefetch = 0 : i64, scratch_operands = 0 : i64, tpu.core_type = #tpu.core_type<tc>, window_params = [{transform_indices = @transform_0, window_bounds = array<i64: 1, 9, 16, 8>}, {transform_indices = @transform_1, window_bounds = array<i64: 1, 9, 8, 16>}, {transform_indices = @transform_2, window_bounds = array<i64: 1, 9, 16, 16>}]} {
    %c0 = arith.constant 0 : index
    %c0_0 = arith.constant 0 : index
    %c0_1 = arith.constant 0 : index
    %c0_2 = arith.constant 0 : index
    %0 = vector.load %arg1[%c0, %c0_0, %c0_1, %c0_2] : memref<1x9x16x8xf32, #tpu.memory_space<vmem>>, vector<1x1x16x8xf32>
    %1 = vector.shape_cast %0 : vector<1x1x16x8xf32> to vector<16x8xf32>
    %c0_3 = arith.constant 0 : index
    %c0_4 = arith.constant 0 : index
    %c0_5 = arith.constant 0 : index
    %c0_6 = arith.constant 0 : index
    %2 = vector.load %arg2[%c0_3, %c0_4, %c0_5, %c0_6] : memref<1x9x8x16xf32, #tpu.memory_space<vmem>>, vector<1x1x8x16xf32>
    %3 = vector.shape_cast %2 : vector<1x1x8x16xf32> to vector<8x16xf32>
    %4 = arith.mulf %1, %1 : vector<16x8xf32>
    %cst = arith.constant dense<0.000000e+00> : vector<16xf32>
    %5 = vector.multi_reduction <add>, %4, %cst [1] : vector<16x8xf32> to vector<16xf32>
    %6 = vector.shape_cast %5 : vector<16xf32> to vector<16x1xf32>
    %7 = math.sqrt %6 : vector<16x1xf32>
    %cst_7 = arith.constant 9.99999996E-13 : f32
    %8 = vector.broadcast %cst_7 : f32 to vector<16x1xf32>
    %9 = arith.maximumf %7, %8 : vector<16x1xf32>
    %10 = vector.broadcast %9 : vector<16x1xf32> to vector<16x8xf32>
    %11 = arith.divf %1, %10 : vector<16x8xf32>
    %12 = arith.mulf %3, %3 : vector<8x16xf32>
    %cst_8 = arith.constant dense<0.000000e+00> : vector<16xf32>
    %13 = vector.multi_reduction <add>, %12, %cst_8 [0] : vector<8x16xf32> to vector<16xf32>
    %14 = vector.shape_cast %13 : vector<16xf32> to vector<1x16xf32>
    %15 = math.sqrt %14 : vector<1x16xf32>
    %cst_9 = arith.constant 9.99999996E-13 : f32
    %16 = vector.broadcast %cst_9 : f32 to vector<1x16xf32>
    %17 = arith.maximumf %15, %16 : vector<1x16xf32>
    %18 = vector.broadcast %17 : vector<1x16xf32> to vector<8x16xf32>
    %19 = arith.divf %3, %18 : vector<8x16xf32>
    %cst_10 = arith.constant dense<0.000000e+00> : vector<16x16xf32>
    %20 = tpu.matmul %11, %19, %cst_10 {dimension_numbers = #tpu.dot_dimension_numbers<[1], [0], [0], [1], [0, 0, 1, 1], [], []>} : vector<16x8xf32>, vector<8x16xf32>, vector<16x16xf32> -> vector<16x16xf32>
    %cst_11 = arith.constant 0.000000e+00 : f32
    %21 = vector.broadcast %cst_11 : f32 to vector<16x16xf32>
    %22 = arith.maximumf %20, %21 : vector<16x16xf32>
    %c0_12 = arith.constant 0 : index
    %c0_13 = arith.constant 0 : index
    %c0_14 = arith.constant 0 : index
    %c0_15 = arith.constant 0 : index
    %23 = vector.load %arg3[%c0_12, %c0_13, %c0_14, %c0_15] : memref<1x9x16x16xf32, #tpu.memory_space<vmem>>, vector<1x1x16x16xf32>
    %24 = vector.shape_cast %23 : vector<1x1x16x16xf32> to vector<16x16xf32>
    %25 = vector.shape_cast %22 : vector<16x16xf32> to vector<1x1x16x16xf32>
    tpu.vector_store %arg3[%c0_12, %c0_13, %c0_14, %c0_15], %25 {strides = array<i32>} : memref<1x9x16x16xf32, #tpu.memory_space<vmem>>, vector<1x1x16x16xf32>,
    %c0_16 = arith.constant 0 : index
    %c1 = arith.constant 1 : index
    %c0_17 = arith.constant 0 : index
    %c0_18 = arith.constant 0 : index
    %26 = vector.load %arg1[%c0_16, %c1, %c0_17, %c0_18] : memref<1x9x16x8xf32, #tpu.memory_space<vmem>>, vector<1x1x16x8xf32>
    %27 = vector.shape_cast %26 : vector<1x1x16x8xf32> to vector<16x8xf32>
    %c0_19 = arith.constant 0 : index
    %c1_20 = arith.constant 1 : index
    %c0_21 = arith.constant 0 : index
    %c0_22 = arith.constant 0 : index
    %28 = vector.load %arg2[%c0_19, %c1_20, %c0_21, %c0_22] : memref<1x9x8x16xf32, #tpu.memory_space<vmem>>, vector<1x1x8x16xf32>
    %29 = vector.shape_cast %28 : vector<1x1x8x16xf32> to vector<8x16xf32>
    %30 = arith.mulf %27, %27 : vector<16x8xf32>
    %cst_23 = arith.constant dense<0.000000e+00> : vector<16xf32>
    %31 = vector.multi_reduction <add>, %30, %cst_23 [1] : vector<16x8xf32> to vector<16xf32>
    %32 = vector.shape_cast %31 : vector<16xf32> to vector<16x1xf32>
    %33 = math.sqrt %32 : vector<16x1xf32>
    %cst_24 = arith.constant 9.99999996E-13 : f32
    %34 = vector.broadcast %cst_24 : f32 to vector<16x1xf32>
    %35 = arith.maximumf %33, %34 : vector<16x1xf32>
    %36 = vector.broadcast %35 : vector<16x1xf32> to vector<16x8xf32>
    %37 = arith.divf %27, %36 : vector<16x8xf32>
    %38 = arith.mulf %29, %29 : vector<8x16xf32>
    %cst_25 = arith.constant dense<0.000000e+00> : vector<16xf32>
    %39 = vector.multi_reduction <add>, %38, %cst_25 [0] : vector<8x16xf32> to vector<16xf32>
    %40 = vector.shape_cast %39 : vector<16xf32> to vector<1x16xf32>
    %41 = math.sqrt %40 : vector<1x16xf32>
    %cst_26 = arith.constant 9.99999996E-13 : f32
    %42 = vector.broadcast %cst_26 : f32 to vector<1x16xf32>
    %43 = arith.maximumf %41, %42 : vector<1x16xf32>
    %44 = vector.broadcast %43 : vector<1x16xf32> to vector<8x16xf32>
    %45 = arith.divf %29, %44 : vector<8x16xf32>
    %cst_27 = arith.constant dense<0.000000e+00> : vector<16x16xf32>
    %46 = tpu.matmul %37, %45, %cst_27 {dimension_numbers = #tpu.dot_dimension_numbers<[1], [0], [0], [1], [0, 0, 1, 1], [], []>} : vector<16x8xf32>, vector<8x16xf32>, vector<16x16xf32> -> vector<16x16xf32>
    %cst_28 = arith.constant 0.000000e+00 : f32
    %47 = vector.broadcast %cst_28 : f32 to vector<16x16xf32>
    %48 = arith.maximumf %46, %47 : vector<16x16xf32>
    %c0_29 = arith.constant 0 : index
    %c1_30 = arith.constant 1 : index
    %c0_31 = arith.constant 0 : index
    %c0_32 = arith.constant 0 : index
    %49 = vector.load %arg3[%c0_29, %c1_30, %c0_31, %c0_32] : memref<1x9x16x16xf32, #tpu.memory_space<vmem>>, vector<1x1x16x16xf32>
    %50 = vector.shape_cast %49 : vector<1x1x16x16xf32> to vector<16x16xf32>
    %51 = vector.shape_cast %48 : vector<16x16xf32> to vector<1x1x16x16xf32>
    tpu.vector_store %arg3[%c0_29, %c1_30, %c0_31, %c0_32], %51 {strides = array<i32>} : memref<1x9x16x16xf32, #tpu.memory_space<vmem>>, vector<1x1x16x16xf32>,
    %c0_33 = arith.constant 0 : index
    %c2 = arith.constant 2 : index
    %c0_34 = arith.constant 0 : index
    %c0_35 = arith.constant 0 : index
    %52 = vector.load %arg1[%c0_33, %c2, %c0_34, %c0_35] : memref<1x9x16x8xf32, #tpu.memory_space<vmem>>, vector<1x1x16x8xf32>
    %53 = vector.shape_cast %52 : vector<1x1x16x8xf32> to vector<16x8xf32>
    %c0_36 = arith.constant 0 : index
    %c2_37 = arith.constant 2 : index
    %c0_38 = arith.constant 0 : index
    %c0_39 = arith.constant 0 : index
    %54 = vector.load %arg2[%c0_36, %c2_37, %c0_38, %c0_39] : memref<1x9x8x16xf32, #tpu.memory_space<vmem>>, vector<1x1x8x16xf32>
    %55 = vector.shape_cast %54 : vector<1x1x8x16xf32> to vector<8x16xf32>
    %56 = arith.mulf %53, %53 : vector<16x8xf32>
    %cst_40 = arith.constant dense<0.000000e+00> : vector<16xf32>
    %57 = vector.multi_reduction <add>, %56, %cst_40 [1] : vector<16x8xf32> to vector<16xf32>
    %58 = vector.shape_cast %57 : vector<16xf32> to vector<16x1xf32>
    %59 = math.sqrt %58 : vector<16x1xf32>
    %cst_41 = arith.constant 9.99999996E-13 : f32
    %60 = vector.broadcast %cst_41 : f32 to vector<16x1xf32>
    %61 = arith.maximumf %59, %60 : vector<16x1xf32>
    %62 = vector.broadcast %61 : vector<16x1xf32> to vector<16x8xf32>
    %63 = arith.divf %53, %62 : vector<16x8xf32>
    %64 = arith.mulf %55, %55 : vector<8x16xf32>
    %cst_42 = arith.constant dense<0.000000e+00> : vector<16xf32>
    %65 = vector.multi_reduction <add>, %64, %cst_42 [0] : vector<8x16xf32> to vector<16xf32>
    %66 = vector.shape_cast %65 : vector<16xf32> to vector<1x16xf32>
    %67 = math.sqrt %66 : vector<1x16xf32>
    %cst_43 = arith.constant 9.99999996E-13 : f32
    %68 = vector.broadcast %cst_43 : f32 to vector<1x16xf32>
    %69 = arith.maximumf %67, %68 : vector<1x16xf32>
    %70 = vector.broadcast %69 : vector<1x16xf32> to vector<8x16xf32>
    %71 = arith.divf %55, %70 : vector<8x16xf32>
    %cst_44 = arith.constant dense<0.000000e+00> : vector<16x16xf32>
    %72 = tpu.matmul %63, %71, %cst_44 {dimension_numbers = #tpu.dot_dimension_numbers<[1], [0], [0], [1], [0, 0, 1, 1], [], []>} : vector<16x8xf32>, vector<8x16xf32>, vector<16x16xf32> -> vector<16x16xf32>
    %cst_45 = arith.constant 0.000000e+00 : f32
    %73 = vector.broadcast %cst_45 : f32 to vector<16x16xf32>
    %74 = arith.maximumf %72, %73 : vector<16x16xf32>
    %c0_46 = arith.constant 0 : index
    %c2_47 = arith.constant 2 : index
    %c0_48 = arith.constant 0 : index
    %c0_49 = arith.constant 0 : index
    %75 = vector.load %arg3[%c0_46, %c2_47, %c0_48, %c0_49] : memref<1x9x16x16xf32, #tpu.memory_space<vmem>>, vector<1x1x16x16xf32>
    %76 = vector.shape_cast %75 : vector<1x1x16x16xf32> to vector<16x16xf32>
    %77 = vector.shape_cast %74 : vector<16x16xf32> to vector<1x1x16x16xf32>
    tpu.vector_store %arg3[%c0_46, %c2_47, %c0_48, %c0_49], %77 {strides = array<i32>} : memref<1x9x16x16xf32, #tpu.memory_space<vmem>>, vector<1x1x16x16xf32>,
    %c0_50 = arith.constant 0 : index
    %c3 = arith.constant 3 : index
    %c0_51 = arith.constant 0 : index
    %c0_52 = arith.constant 0 : index
    %78 = vector.load %arg1[%c0_50, %c3, %c0_51, %c0_52] : memref<1x9x16x8xf32, #tpu.memory_space<vmem>>, vector<1x1x16x8xf32>
    %79 = vector.shape_cast %78 : vector<1x1x16x8xf32> to vector<16x8xf32>
    %c0_53 = arith.constant 0 : index
    %c3_54 = arith.constant 3 : index
    %c0_55 = arith.constant 0 : index
    %c0_56 = arith.constant 0 : index
    %80 = vector.load %arg2[%c0_53, %c3_54, %c0_55, %c0_56] : memref<1x9x8x16xf32, #tpu.memory_space<vmem>>, vector<1x1x8x16xf32>
    %81 = vector.shape_cast %80 : vector<1x1x8x16xf32> to vector<8x16xf32>
    %82 = arith.mulf %79, %79 : vector<16x8xf32>
    %cst_57 = arith.constant dense<0.000000e+00> : vector<16xf32>
    %83 = vector.multi_reduction <add>, %82, %cst_57 [1] : vector<16x8xf32> to vector<16xf32>
    %84 = vector.shape_cast %83 : vector<16xf32> to vector<16x1xf32>
    %85 = math.sqrt %84 : vector<16x1xf32>
    %cst_58 = arith.constant 9.99999996E-13 : f32
    %86 = vector.broadcast %cst_58 : f32 to vector<16x1xf32>
    %87 = arith.maximumf %85, %86 : vector<16x1xf32>
    %88 = vector.broadcast %87 : vector<16x1xf32> to vector<16x8xf32>
    %89 = arith.divf %79, %88 : vector<16x8xf32>
    %90 = arith.mulf %81, %81 : vector<8x16xf32>
    %cst_59 = arith.constant dense<0.000000e+00> : vector<16xf32>
    %91 = vector.multi_reduction <add>, %90, %cst_59 [0] : vector<8x16xf32> to vector<16xf32>
    %92 = vector.shape_cast %91 : vector<16xf32> to vector<1x16xf32>
    %93 = math.sqrt %92 : vector<1x16xf32>
    %cst_60 = arith.constant 9.99999996E-13 : f32
    %94 = vector.broadcast %cst_60 : f32 to vector<1x16xf32>
    %95 = arith.maximumf %93, %94 : vector<1x16xf32>
    %96 = vector.broadcast %95 : vector<1x16xf32> to vector<8x16xf32>
    %97 = arith.divf %81, %96 : vector<8x16xf32>
    %cst_61 = arith.constant dense<0.000000e+00> : vector<16x16xf32>
    %98 = tpu.matmul %89, %97, %cst_61 {dimension_numbers = #tpu.dot_dimension_numbers<[1], [0], [0], [1], [0, 0, 1, 1], [], []>} : vector<16x8xf32>, vector<8x16xf32>, vector<16x16xf32> -> vector<16x16xf32>
    %cst_62 = arith.constant 0.000000e+00 : f32
    %99 = vector.broadcast %cst_62 : f32 to vector<16x16xf32>
    %100 = arith.maximumf %98, %99 : vector<16x16xf32>
    %c0_63 = arith.constant 0 : index
    %c3_64 = arith.constant 3 : index
    %c0_65 = arith.constant 0 : index
    %c0_66 = arith.constant 0 : index
    %101 = vector.load %arg3[%c0_63, %c3_64, %c0_65, %c0_66] : memref<1x9x16x16xf32, #tpu.memory_space<vmem>>, vector<1x1x16x16xf32>
    %102 = vector.shape_cast %101 : vector<1x1x16x16xf32> to vector<16x16xf32>
    %103 = vector.shape_cast %100 : vector<16x16xf32> to vector<1x1x16x16xf32>
    tpu.vector_store %arg3[%c0_63, %c3_64, %c0_65, %c0_66], %103 {strides = array<i32>} : memref<1x9x16x16xf32, #tpu.memory_space<vmem>>, vector<1x1x16x16xf32>,
    %c0_67 = arith.constant 0 : index
    %c4 = arith.constant 4 : index
    %c0_68 = arith.constant 0 : index
    %c0_69 = arith.constant 0 : index
    %104 = vector.load %arg1[%c0_67, %c4, %c0_68, %c0_69] : memref<1x9x16x8xf32, #tpu.memory_space<vmem>>, vector<1x1x16x8xf32>
    %105 = vector.shape_cast %104 : vector<1x1x16x8xf32> to vector<16x8xf32>
    %c0_70 = arith.constant 0 : index
    %c4_71 = arith.constant 4 : index
    %c0_72 = arith.constant 0 : index
    %c0_73 = arith.constant 0 : index
    %106 = vector.load %arg2[%c0_70, %c4_71, %c0_72, %c0_73] : memref<1x9x8x16xf32, #tpu.memory_space<vmem>>, vector<1x1x8x16xf32>
    %107 = vector.shape_cast %106 : vector<1x1x8x16xf32> to vector<8x16xf32>
    %108 = arith.mulf %105, %105 : vector<16x8xf32>
    %cst_74 = arith.constant dense<0.000000e+00> : vector<16xf32>
    %109 = vector.multi_reduction <add>, %108, %cst_74 [1] : vector<16x8xf32> to vector<16xf32>
    %110 = vector.shape_cast %109 : vector<16xf32> to vector<16x1xf32>
    %111 = math.sqrt %110 : vector<16x1xf32>
    %cst_75 = arith.constant 9.99999996E-13 : f32
    %112 = vector.broadcast %cst_75 : f32 to vector<16x1xf32>
    %113 = arith.maximumf %111, %112 : vector<16x1xf32>
    %114 = vector.broadcast %113 : vector<16x1xf32> to vector<16x8xf32>
    %115 = arith.divf %105, %114 : vector<16x8xf32>
    %116 = arith.mulf %107, %107 : vector<8x16xf32>
    %cst_76 = arith.constant dense<0.000000e+00> : vector<16xf32>
    %117 = vector.multi_reduction <add>, %116, %cst_76 [0] : vector<8x16xf32> to vector<16xf32>
    %118 = vector.shape_cast %117 : vector<16xf32> to vector<1x16xf32>
    %119 = math.sqrt %118 : vector<1x16xf32>
    %cst_77 = arith.constant 9.99999996E-13 : f32
    %120 = vector.broadcast %cst_77 : f32 to vector<1x16xf32>
    %121 = arith.maximumf %119, %120 : vector<1x16xf32>
    %122 = vector.broadcast %121 : vector<1x16xf32> to vector<8x16xf32>
    %123 = arith.divf %107, %122 : vector<8x16xf32>
    %cst_78 = arith.constant dense<0.000000e+00> : vector<16x16xf32>
    %124 = tpu.matmul %115, %123, %cst_78 {dimension_numbers = #tpu.dot_dimension_numbers<[1], [0], [0], [1], [0, 0, 1, 1], [], []>} : vector<16x8xf32>, vector<8x16xf32>, vector<16x16xf32> -> vector<16x16xf32>
    %cst_79 = arith.constant 0.000000e+00 : f32
    %125 = vector.broadcast %cst_79 : f32 to vector<16x16xf32>
    %126 = arith.maximumf %124, %125 : vector<16x16xf32>
    %c0_80 = arith.constant 0 : index
    %c4_81 = arith.constant 4 : index
    %c0_82 = arith.constant 0 : index
    %c0_83 = arith.constant 0 : index
    %127 = vector.load %arg3[%c0_80, %c4_81, %c0_82, %c0_83] : memref<1x9x16x16xf32, #tpu.memory_space<vmem>>, vector<1x1x16x16xf32>
    %128 = vector.shape_cast %127 : vector<1x1x16x16xf32> to vector<16x16xf32>
    %129 = vector.shape_cast %126 : vector<16x16xf32> to vector<1x1x16x16xf32>
    tpu.vector_store %arg3[%c0_80, %c4_81, %c0_82, %c0_83], %129 {strides = array<i32>} : memref<1x9x16x16xf32, #tpu.memory_space<vmem>>, vector<1x1x16x16xf32>,
    %c0_84 = arith.constant 0 : index
    %c5 = arith.constant 5 : index
    %c0_85 = arith.constant 0 : index
    %c0_86 = arith.constant 0 : index
    %130 = vector.load %arg1[%c0_84, %c5, %c0_85, %c0_86] : memref<1x9x16x8xf32, #tpu.memory_space<vmem>>, vector<1x1x16x8xf32>
    %131 = vector.shape_cast %130 : vector<1x1x16x8xf32> to vector<16x8xf32>
    %c0_87 = arith.constant 0 : index
    %c5_88 = arith.constant 5 : index
    %c0_89 = arith.constant 0 : index
    %c0_90 = arith.constant 0 : index
    %132 = vector.load %arg2[%c0_87, %c5_88, %c0_89, %c0_90] : memref<1x9x8x16xf32, #tpu.memory_space<vmem>>, vector<1x1x8x16xf32>
    %133 = vector.shape_cast %132 : vector<1x1x8x16xf32> to vector<8x16xf32>
    %134 = arith.mulf %131, %131 : vector<16x8xf32>
    %cst_91 = arith.constant dense<0.000000e+00> : vector<16xf32>
    %135 = vector.multi_reduction <add>, %134, %cst_91 [1] : vector<16x8xf32> to vector<16xf32>
    %136 = vector.shape_cast %135 : vector<16xf32> to vector<16x1xf32>
    %137 = math.sqrt %136 : vector<16x1xf32>
    %cst_92 = arith.constant 9.99999996E-13 : f32
    %138 = vector.broadcast %cst_92 : f32 to vector<16x1xf32>
    %139 = arith.maximumf %137, %138 : vector<16x1xf32>
    %140 = vector.broadcast %139 : vector<16x1xf32> to vector<16x8xf32>
    %141 = arith.divf %131, %140 : vector<16x8xf32>
    %142 = arith.mulf %133, %133 : vector<8x16xf32>
    %cst_93 = arith.constant dense<0.000000e+00> : vector<16xf32>
    %143 = vector.multi_reduction <add>, %142, %cst_93 [0] : vector<8x16xf32> to vector<16xf32>
    %144 = vector.shape_cast %143 : vector<16xf32> to vector<1x16xf32>
    %145 = math.sqrt %144 : vector<1x16xf32>
    %cst_94 = arith.constant 9.99999996E-13 : f32
    %146 = vector.broadcast %cst_94 : f32 to vector<1x16xf32>
    %147 = arith.maximumf %145, %146 : vector<1x16xf32>
    %148 = vector.broadcast %147 : vector<1x16xf32> to vector<8x16xf32>
    %149 = arith.divf %133, %148 : vector<8x16xf32>
    %cst_95 = arith.constant dense<0.000000e+00> : vector<16x16xf32>
    %150 = tpu.matmul %141, %149, %cst_95 {dimension_numbers = #tpu.dot_dimension_numbers<[1], [0], [0], [1], [0, 0, 1, 1], [], []>} : vector<16x8xf32>, vector<8x16xf32>, vector<16x16xf32> -> vector<16x16xf32>
    %cst_96 = arith.constant 0.000000e+00 : f32
    %151 = vector.broadcast %cst_96 : f32 to vector<16x16xf32>
    %152 = arith.maximumf %150, %151 : vector<16x16xf32>
    %c0_97 = arith.constant 0 : index
    %c5_98 = arith.constant 5 : index
    %c0_99 = arith.constant 0 : index
    %c0_100 = arith.constant 0 : index
    %153 = vector.load %arg3[%c0_97, %c5_98, %c0_99, %c0_100] : memref<1x9x16x16xf32, #tpu.memory_space<vmem>>, vector<1x1x16x16xf32>
    %154 = vector.shape_cast %153 : vector<1x1x16x16xf32> to vector<16x16xf32>
    %155 = vector.shape_cast %152 : vector<16x16xf32> to vector<1x1x16x16xf32>
    tpu.vector_store %arg3[%c0_97, %c5_98, %c0_99, %c0_100], %155 {strides = array<i32>} : memref<1x9x16x16xf32, #tpu.memory_space<vmem>>, vector<1x1x16x16xf32>,
    %c0_101 = arith.constant 0 : index
    %c6 = arith.constant 6 : index
    %c0_102 = arith.constant 0 : index
    %c0_103 = arith.constant 0 : index
    %156 = vector.load %arg1[%c0_101, %c6, %c0_102, %c0_103] : memref<1x9x16x8xf32, #tpu.memory_space<vmem>>, vector<1x1x16x8xf32>
    %157 = vector.shape_cast %156 : vector<1x1x16x8xf32> to vector<16x8xf32>
    %c0_104 = arith.constant 0 : index
    %c6_105 = arith.constant 6 : index
    %c0_106 = arith.constant 0 : index
    %c0_107 = arith.constant 0 : index
    %158 = vector.load %arg2[%c0_104, %c6_105, %c0_106, %c0_107] : memref<1x9x8x16xf32, #tpu.memory_space<vmem>>, vector<1x1x8x16xf32>
    %159 = vector.shape_cast %158 : vector<1x1x8x16xf32> to vector<8x16xf32>
    %160 = arith.mulf %157, %157 : vector<16x8xf32>
    %cst_108 = arith.constant dense<0.000000e+00> : vector<16xf32>
    %161 = vector.multi_reduction <add>, %160, %cst_108 [1] : vector<16x8xf32> to vector<16xf32>
    %162 = vector.shape_cast %161 : vector<16xf32> to vector<16x1xf32>
    %163 = math.sqrt %162 : vector<16x1xf32>
    %cst_109 = arith.constant 9.99999996E-13 : f32
    %164 = vector.broadcast %cst_109 : f32 to vector<16x1xf32>
    %165 = arith.maximumf %163, %164 : vector<16x1xf32>
    %166 = vector.broadcast %165 : vector<16x1xf32> to vector<16x8xf32>
    %167 = arith.divf %157, %166 : vector<16x8xf32>
    %168 = arith.mulf %159, %159 : vector<8x16xf32>
    %cst_110 = arith.constant dense<0.000000e+00> : vector<16xf32>
    %169 = vector.multi_reduction <add>, %168, %cst_110 [0] : vector<8x16xf32> to vector<16xf32>
    %170 = vector.shape_cast %169 : vector<16xf32> to vector<1x16xf32>
    %171 = math.sqrt %170 : vector<1x16xf32>
    %cst_111 = arith.constant 9.99999996E-13 : f32
    %172 = vector.broadcast %cst_111 : f32 to vector<1x16xf32>
    %173 = arith.maximumf %171, %172 : vector<1x16xf32>
    %174 = vector.broadcast %173 : vector<1x16xf32> to vector<8x16xf32>
    %175 = arith.divf %159, %174 : vector<8x16xf32>
    %cst_112 = arith.constant dense<0.000000e+00> : vector<16x16xf32>
    %176 = tpu.matmul %167, %175, %cst_112 {dimension_numbers = #tpu.dot_dimension_numbers<[1], [0], [0], [1], [0, 0, 1, 1], [], []>} : vector<16x8xf32>, vector<8x16xf32>, vector<16x16xf32> -> vector<16x16xf32>
    %cst_113 = arith.constant 0.000000e+00 : f32
    %177 = vector.broadcast %cst_113 : f32 to vector<16x16xf32>
    %178 = arith.maximumf %176, %177 : vector<16x16xf32>
    %c0_114 = arith.constant 0 : index
    %c6_115 = arith.constant 6 : index
    %c0_116 = arith.constant 0 : index
    %c0_117 = arith.constant 0 : index
    %179 = vector.load %arg3[%c0_114, %c6_115, %c0_116, %c0_117] : memref<1x9x16x16xf32, #tpu.memory_space<vmem>>, vector<1x1x16x16xf32>
    %180 = vector.shape_cast %179 : vector<1x1x16x16xf32> to vector<16x16xf32>
    %181 = vector.shape_cast %178 : vector<16x16xf32> to vector<1x1x16x16xf32>
    tpu.vector_store %arg3[%c0_114, %c6_115, %c0_116, %c0_117], %181 {strides = array<i32>} : memref<1x9x16x16xf32, #tpu.memory_space<vmem>>, vector<1x1x16x16xf32>,
    %c0_118 = arith.constant 0 : index
    %c7 = arith.constant 7 : index
    %c0_119 = arith.constant 0 : index
    %c0_120 = arith.constant 0 : index
    %182 = vector.load %arg1[%c0_118, %c7, %c0_119, %c0_120] : memref<1x9x16x8xf32, #tpu.memory_space<vmem>>, vector<1x1x16x8xf32>
    %183 = vector.shape_cast %182 : vector<1x1x16x8xf32> to vector<16x8xf32>
    %c0_121 = arith.constant 0 : index
    %c7_122 = arith.constant 7 : index
    %c0_123 = arith.constant 0 : index
    %c0_124 = arith.constant 0 : index
    %184 = vector.load %arg2[%c0_121, %c7_122, %c0_123, %c0_124] : memref<1x9x8x16xf32, #tpu.memory_space<vmem>>, vector<1x1x8x16xf32>
    %185 = vector.shape_cast %184 : vector<1x1x8x16xf32> to vector<8x16xf32>
    %186 = arith.mulf %183, %183 : vector<16x8xf32>
    %cst_125 = arith.constant dense<0.000000e+00> : vector<16xf32>
    %187 = vector.multi_reduction <add>, %186, %cst_125 [1] : vector<16x8xf32> to vector<16xf32>
    %188 = vector.shape_cast %187 : vector<16xf32> to vector<16x1xf32>
    %189 = math.sqrt %188 : vector<16x1xf32>
    %cst_126 = arith.constant 9.99999996E-13 : f32
    %190 = vector.broadcast %cst_126 : f32 to vector<16x1xf32>
    %191 = arith.maximumf %189, %190 : vector<16x1xf32>
    %192 = vector.broadcast %191 : vector<16x1xf32> to vector<16x8xf32>
    %193 = arith.divf %183, %192 : vector<16x8xf32>
    %194 = arith.mulf %185, %185 : vector<8x16xf32>
    %cst_127 = arith.constant dense<0.000000e+00> : vector<16xf32>
    %195 = vector.multi_reduction <add>, %194, %cst_127 [0] : vector<8x16xf32> to vector<16xf32>
    %196 = vector.shape_cast %195 : vector<16xf32> to vector<1x16xf32>
    %197 = math.sqrt %196 : vector<1x16xf32>
    %cst_128 = arith.constant 9.99999996E-13 : f32
    %198 = vector.broadcast %cst_128 : f32 to vector<1x16xf32>
    %199 = arith.maximumf %197, %198 : vector<1x16xf32>
    %200 = vector.broadcast %199 : vector<1x16xf32> to vector<8x16xf32>
    %201 = arith.divf %185, %200 : vector<8x16xf32>
    %cst_129 = arith.constant dense<0.000000e+00> : vector<16x16xf32>
    %202 = tpu.matmul %193, %201, %cst_129 {dimension_numbers = #tpu.dot_dimension_numbers<[1], [0], [0], [1], [0, 0, 1, 1], [], []>} : vector<16x8xf32>, vector<8x16xf32>, vector<16x16xf32> -> vector<16x16xf32>
    %cst_130 = arith.constant 0.000000e+00 : f32
    %203 = vector.broadcast %cst_130 : f32 to vector<16x16xf32>
    %204 = arith.maximumf %202, %203 : vector<16x16xf32>
    %c0_131 = arith.constant 0 : index
    %c7_132 = arith.constant 7 : index
    %c0_133 = arith.constant 0 : index
    %c0_134 = arith.constant 0 : index
    %205 = vector.load %arg3[%c0_131, %c7_132, %c0_133, %c0_134] : memref<1x9x16x16xf32, #tpu.memory_space<vmem>>, vector<1x1x16x16xf32>
    %206 = vector.shape_cast %205 : vector<1x1x16x16xf32> to vector<16x16xf32>
    %207 = vector.shape_cast %204 : vector<16x16xf32> to vector<1x1x16x16xf32>
    tpu.vector_store %arg3[%c0_131, %c7_132, %c0_133, %c0_134], %207 {strides = array<i32>} : memref<1x9x16x16xf32, #tpu.memory_space<vmem>>, vector<1x1x16x16xf32>,
    %c0_135 = arith.constant 0 : index
    %c8 = arith.constant 8 : index
    %c0_136 = arith.constant 0 : index
    %c0_137 = arith.constant 0 : index
    %208 = vector.load %arg1[%c0_135, %c8, %c0_136, %c0_137] : memref<1x9x16x8xf32, #tpu.memory_space<vmem>>, vector<1x1x16x8xf32>
    %209 = vector.shape_cast %208 : vector<1x1x16x8xf32> to vector<16x8xf32>
    %c0_138 = arith.constant 0 : index
    %c8_139 = arith.constant 8 : index
    %c0_140 = arith.constant 0 : index
    %c0_141 = arith.constant 0 : index
    %210 = vector.load %arg2[%c0_138, %c8_139, %c0_140, %c0_141] : memref<1x9x8x16xf32, #tpu.memory_space<vmem>>, vector<1x1x8x16xf32>
    %211 = vector.shape_cast %210 : vector<1x1x8x16xf32> to vector<8x16xf32>
    %212 = arith.mulf %209, %209 : vector<16x8xf32>
    %cst_142 = arith.constant dense<0.000000e+00> : vector<16xf32>
    %213 = vector.multi_reduction <add>, %212, %cst_142 [1] : vector<16x8xf32> to vector<16xf32>
    %214 = vector.shape_cast %213 : vector<16xf32> to vector<16x1xf32>
    %215 = math.sqrt %214 : vector<16x1xf32>
    %cst_143 = arith.constant 9.99999996E-13 : f32
    %216 = vector.broadcast %cst_143 : f32 to vector<16x1xf32>
    %217 = arith.maximumf %215, %216 : vector<16x1xf32>
    %218 = vector.broadcast %217 : vector<16x1xf32> to vector<16x8xf32>
    %219 = arith.divf %209, %218 : vector<16x8xf32>
    %220 = arith.mulf %211, %211 : vector<8x16xf32>
    %cst_144 = arith.constant dense<0.000000e+00> : vector<16xf32>
    %221 = vector.multi_reduction <add>, %220, %cst_144 [0] : vector<8x16xf32> to vector<16xf32>
    %222 = vector.shape_cast %221 : vector<16xf32> to vector<1x16xf32>
    %223 = math.sqrt %222 : vector<1x16xf32>
    %cst_145 = arith.constant 9.99999996E-13 : f32
    %224 = vector.broadcast %cst_145 : f32 to vector<1x16xf32>
    %225 = arith.maximumf %223, %224 : vector<1x16xf32>
    %226 = vector.broadcast %225 : vector<1x16xf32> to vector<8x16xf32>
    %227 = arith.divf %211, %226 : vector<8x16xf32>
    %cst_146 = arith.constant dense<0.000000e+00> : vector<16x16xf32>
    %228 = tpu.matmul %219, %227, %cst_146 {dimension_numbers = #tpu.dot_dimension_numbers<[1], [0], [0], [1], [0, 0, 1, 1], [], []>} : vector<16x8xf32>, vector<8x16xf32>, vector<16x16xf32> -> vector<16x16xf32>
    %cst_147 = arith.constant 0.000000e+00 : f32
    %229 = vector.broadcast %cst_147 : f32 to vector<16x16xf32>
    %230 = arith.maximumf %228, %229 : vector<16x16xf32>
    %c0_148 = arith.constant 0 : index
    %c8_149 = arith.constant 8 : index
    %c0_150 = arith.constant 0 : index
    %c0_151 = arith.constant 0 : index
    %231 = vector.load %arg3[%c0_148, %c8_149, %c0_150, %c0_151] : memref<1x9x16x16xf32, #tpu.memory_space<vmem>>, vector<1x1x16x16xf32>
    %232 = vector.shape_cast %231 : vector<1x1x16x16xf32> to vector<16x16xf32>
    %233 = vector.shape_cast %230 : vector<16x16xf32> to vector<1x1x16x16xf32>
    tpu.vector_store %arg3[%c0_148, %c8_149, %c0_150, %c0_151], %233 {strides = array<i32>} : memref<1x9x16x16xf32, #tpu.memory_space<vmem>>, vector<1x1x16x16xf32>,
    return
  }
  func.func @transform_0(%arg0: i32) -> (i32, i32, i32, i32) {
    %c0_i32 = arith.constant 0 : i32
    %c0_i32_0 = arith.constant 0 : i32
    %c0_i32_1 = arith.constant 0 : i32
    %c0_i32_2 = arith.constant 0 : i32
    return %arg0, %c0_i32, %c0_i32_0, %c0_i32_1 : i32, i32, i32, i32
  }
  func.func @transform_1(%arg0: i32) -> (i32, i32, i32, i32) {
    %c0_i32 = arith.constant 0 : i32
    %c0_i32_0 = arith.constant 0 : i32
    %c0_i32_1 = arith.constant 0 : i32
    %c0_i32_2 = arith.constant 0 : i32
    return %arg0, %c0_i32, %c0_i32_0, %c0_i32_1 : i32, i32, i32, i32
  }
  func.func @transform_2(%arg0: i32) -> (i32, i32, i32, i32) {
    %c0_i32 = arith.constant 0 : i32
    %c0_i32_0 = arith.constant 0 : i32
    %c0_i32_1 = arith.constant 0 : i32
    %c0_i32_2 = arith.constant 0 : i32
    return %arg0, %c0_i32, %c0_i32_0, %c0_i32_1 : i32, i32, i32, i32
  }
}

</mosaic_0001>

<bundles_post_ra>
// kernel: tpu_custom_call.1
= control target key start
LH: loop header
LB: loop body
LE: loop exit
PB: predicated region body
PF: predicated region fallthrough
CT: control target
= control target key end

     0   :  { %7 = vsyncpa [#allocation3], 0  ;;  %s2424_s0 = inlined_call_operand.vmem [shape: f32[2,9,16,8], index: 0, kind: input, shape index: {}]   ;;  %s2425_s1 = inlined_call_operand.vmem [shape: f32[2,9,8,16], index: 1, kind: input, shape index: {}]   ;;  %s2426_s2 = inlined_call_operand.hbm [shape: f32[2,9,16,16], index: 2, kind: output, shape index: {}]  }
   0x1   :  { %9 = vsyncpa [#allocation3 + $0x1], 0  ;;  %s1856_s9 = smov 0   ;;  %s1858_s10 = smov 0  }
   0x2   :  { %s1860_s11 = smov 0   ;;  %s1862_s12 = smov 0  }
   0x3 LB: > { %s1877_s13 = sadd.s32 4294967295, %s1836_s12   ;;  %s1482_s14 = sadd.s32 4294967294, %s1836_s12   ;;  %s1836_s12 = sphi %s1862_s12, %s2432_s12   ;;  %s1832_s11 = sphi %s1860_s11, %s2431_s11   ;;  %s1828_s10 = sphi %s1858_s10, %s2430_s10   ;;  %s1824_s9 = sphi %s1856_s9, %s2429_s9  }
   0x4   : > { %s1881_s15 = sadd.s32 1, %s1836_s12   ;;  %s74_s16 = sadd.s32 1, %s1832_s11 }
   0x5   : > { %s71_s17 = ssub.s32 %s1836_s12, %s1881_s15  ;;  %p84_p0 = scmp.ne.s32.totalorder %s1832_s11, %s1828_s10 }
   0x6   : > { %p72_p1 = scmp.eq.s32.totalorder %s71_s17, 0  ;;  %p85_p2 = scmp.eq.s32.totalorder %s1877_s13, 1 }
   0x7   : > { %p90_p3 = scmp.ne.s32.totalorder %s1828_s10, %s1824_s9  ;;  %p91_p4 = scmp.eq.s32.totalorder %s1482_s14, 1 }
   0x8   : > { %s1892_s18 = scalar_select %p72_p1, %s1832_s11, %s74_s16  }
   0x9   : > { %p1894_p5 = por %p85_p2, %p84_p0  ;;  %p1898_p6 = por %p91_p4, %p90_p3 }
   0xa   : > { %p1485_p7 = scmp.ge.s32.totalorder %s1836_s12, 1  ;;  %p125_p8 = scmp.lt.s32.totalorder %s1836_s12, 3 }
   0xc   : > { %p126_p9 = pnand %p1485_p7, %p125_p8 }
   0xd   : > { %p152_p10 = scmp.lt.s32.totalorder (!%p126_p9), %s1877_s13, 1  ;;  %vm167_vm0 = vcmask (!%p126_p9), 64512   ;;  %vm195_vm1 = vcmask (!%p126_p9), 130048   ;;  %s149_s30 = sand.u32 (!%p126_p9), 1, %s1828_s10  }
   0xe   : > { %129 = sbr.rel (%p126_p9) target bundleno = 470 (0x1d6), region = 28  ;;  %s2383_s14 = scalar_lea.sflag (!%p126_p9), [#allocation3], %s149_s30 }
   0xf   : > { %s1621_s3 = smul.u32 (!%p126_p9), 144, %s149_s30  ;;  %s1838_s17 = smov (!%p126_p9), [#allocation2]  }
  0x10   : > { %s1624_s5 = smul.u32 (!%p126_p9), 2304, %s1877_s13 }
  0x11   : > { %s2334_s4 = scalar_lea.vmem (!%p126_p9), [#allocation2], %s1621_s3 }
  0x12   : > { %s1408_s6 = sshll.u32 (!%p126_p9), %s2334_s4, 4  ;;  %s2366_s6 = int_to_ptr.vmem [resolvable:$true] %s1408_s6 }
  0x13   : > { %s1774_s16 = scalar_lea.vmem (!%p126_p9), %s2366_s6, 2304 }
  0x14   : > { %p1775_p11 = scmp.ne.s32.totalorder (!%p126_p9), %s2366_s6, %s1774_s16 }
  0x15   : > { %s1906_s21 = scalar_select %p152_p10, %s1877_s13, 1 }
  0x16   : > { %s2373_s13 = scalar_lea.hbm %s2426_s2, %s1624_s5  ;;  %p1776_p12 = pnand %p1775_p11, %p1894_p5 }
  0x17   : > { %s1622_s22 = smul.u32 144, %s1906_s21 }
  0x18   : > { %s1623_s26 = smul.u32 72, %s1906_s21  ;;  %p1777_p13 = pneg %p1776_p12 }
  0x19   : > { %s1912_s25 = scalar_lea.vmem %s2424_s0, %s1622_s22  ;;  %s1778_s21 = sshll.u32 %s1838_s17, 4  ;;  %s1779_s21 = int_to_ptr.vmem [resolvable:$false] %s1778_s21 }
  0x1a   : > { %v1915_v0 = vld [vmem:[%s1912_s25 + $0x10] sm:$0xff]  ;;  %v1918_v1 = vld [vmem:[%s1912_s25] sm:$0xff]  ;;  %v1930_v6 = vld [vmem:[%s1912_s25 + $0x8] sm:$0xff]  ;;  %s2006_s29 = scalar_lea.vmem %s2425_s1, %s1623_s26  ;;  %s1780_s22 = scalar_lea.vmem %s1779_s21, 4608 }
  0x1b   : > { %v1921_v2 = vld [vmem:[%s1912_s25 + $0x20] sm:$0xff]  ;;  %v303_v3 = vmul.f32 %v1915_v0, %v1915_v0  ;;  %v165_v4 = vmul.f32 %v1918_v1, %v1918_v1  ;;  %v166_v7 = vmul.f32 %v1930_v6, %v1930_v6  ;;  %v1935_v8 = vld [vmem:[%s1912_s25 + $0x28] sm:$0xff]  ;;  %v1938_v9 = vld [vmem:[%s1912_s25 + $0x18] sm:$0xff]  ;;  %p1781_p0 = scmp.lt.s32.totalorder %s2366_s6, %s1779_s21  ;;  %p1782_p1 = scmp.lt.s32.totalorder %s1780_s22, %s1774_s16 }
  0x1c   : > { %v440_v5 = vmul.f32 %v1921_v2, %v1921_v2  ;;  %v441_v14 = vmul.f32 %v1935_v8, %v1935_v8  ;;  %v304_v15 = vmul.f32 %v1938_v9, %v1938_v9  ;;  %v1949_v16 = vld [vmem:[%s1912_s25 + $0x40] sm:$0xff]  ;;  %v1952_v17 = vld [vmem:[%s1912_s25 + $0x30] sm:$0xff]  ;;  %v1961_v22 = vld [vmem:[%s1912_s25 + $0x48] sm:$0xff] }
  0x1d   : > { %v305_v10 = vsel %vm167_vm0, %v303_v3, 0.0  ;;  %v168_v11 = vsel %vm167_vm0, %v165_v4, 0.0  ;;  %v171_v13 = vsel %vm167_vm0, %v166_v7, 0.0  ;;  %v714_v20 = vmul.f32 %v1949_v16, %v1949_v16  ;;  %v1964_v23 = vld [vmem:[%s1912_s25 + $0x38] sm:$0xff]  ;;  %v1973_v28 = vld [vmem:[%s1912_s25 + $0x60] sm:$0xff]  ;;  %v1976_v29 = vld [vmem:[%s1912_s25 + $0x50] sm:$0xff]  ;;  %p1783_p2 = por %p1782_p1, %p1781_p0 }
  0x1e   : > { %306 = vadd.xlane.f32.xlu1 %v305_v10  ;;  %169 = vadd.xlane.f32.xlu0 %v168_v11  ;;  %v442_v12 = vsel %vm167_vm0, %v440_v5, 0.0  ;;  %v445_v18 = vsel %vm167_vm0, %v441_v14, 0.0  ;;  %v308_v19 = vsel %vm167_vm0, %v304_v15, 0.0  ;;  %v577_v21 = vmul.f32 %v1952_v17, %v1952_v17  ;;  %v1985_v34 = vld [vmem:[%s1912_s25 + $0x68] sm:$0xff]  ;;  %v1988_v35 = vld [vmem:[%s1912_s25 + $0x58] sm:$0xff]  ;;  %v1998_v40 = vld [vmem:[%s1912_s25 + $0x80] sm:$0xff] }
  0x1f   : > { %v716_v24 = vsel %vm167_vm0, %v714_v20, 0.0  ;;  %v715_v26 = vmul.f32 %v1961_v22, %v1961_v22  ;;  %v578_v27 = vmul.f32 %v1964_v23, %v1964_v23  ;;  %v988_v32 = vmul.f32 %v1973_v28, %v1973_v28  ;;  %v2001_v41 = vld [vmem:[%s1912_s25 + $0x70] sm:$0xff]  ;;  %v2009_v42 = vld [vmem:[%s2006_s29] sm:$0xff]  ;;  %v2020_v48 = vld [vmem:[%s1912_s25 + $0x88] sm:$0xff]  ;;  %p1784_p3 = pnand %p1783_p2, %p1777_p13 }
  0x20   : > { %v579_v25 = vsel %vm167_vm0, %v577_v21, 0.0  ;;  %v851_v33 = vmul.f32 %v1976_v29, %v1976_v29  ;;  %v989_v38 = vmul.f32 %v1985_v34, %v1985_v34  ;;  %v852_v39 = vmul.f32 %v1988_v35, %v1988_v35  ;;  %v2023_v49 = vld [vmem:[%s1912_s25 + $0x78] sm:$0xff]  ;;  %v2027_v52 = vld [vmem:[%s2006_s29 + $0x8] sm:$0xff]  ;;  %v2030_v53 = vld [vmem:[%s2006_s29 + $0x10] sm:$0xff] }
  0x21   : > { %v719_v30 = vsel %vm167_vm0, %v715_v26, 0.0  ;;  %v582_v31 = vsel %vm167_vm0, %v578_v27, 0.0  ;;  %v990_v36 = vsel %vm167_vm0, %v988_v32, 0.0  ;;  %v1262_v43 = vmul.f32 %v1998_v40, %v1998_v40 }
  0x22   : > { %443 = vadd.xlane.f32.xlu1 %v442_v12  ;;  %172 = vadd.xlane.f32.xlu0 %v171_v13  ;;  %v853_v37 = vsel %vm167_vm0, %v851_v33, 0.0  ;;  %v194_v44 = vmul.f32 %v2009_v42, %v2009_v42  ;;  %v993_v45 = vsel %vm167_vm0, %v989_v38, 0.0  ;;  %v856_v46 = vsel %vm167_vm0, %v852_v39, 0.0 }
  0x23   : > { %v1125_v47 = vmul.f32 %v2001_v41, %v2001_v41  ;;  %v1263_v54 = vmul.f32 %v2020_v48, %v2020_v48  ;;  %v331_v55 = vmul.f32 %v2027_v52, %v2027_v52  ;;  %v468_v56 = vmul.f32 %v2030_v53, %v2030_v53 }
  0x24   : > { %v196_v50 = vsel %vm195_vm1, %v194_v44, 0.0  ;;  %v1264_v57 = vsel %vm167_vm0, %v1262_v43, 0.0  ;;  %v1126_v59 = vmul.f32 %v2023_v49, %v2023_v49 }
  0x25   : > { %v197_v51 = vrot.slane %v196_v50, 4  ;;  %v1127_v58 = vsel %vm167_vm0, %v1125_v47, 0.0  ;;  %v332_v61 = vsel %vm195_vm1, %v331_v55, 0.0  ;;  %v469_v62 = vsel %vm195_vm1, %v468_v56, 0.0 }
  0x26   : > { %446 = vadd.xlane.f32.xlu1 %v445_v18  ;;  %309 = vadd.xlane.f32.xlu0 %v308_v19  ;;  %v333_v3 = vrot.slane %v332_v61, 4  ;;  %v470_v4 = vrot.slane %v469_v62, 4  ;;  %v1267_v5 = vsel %vm167_vm0, %v1263_v54, 0.0  ;;  %v1130_v7 = vsel %vm167_vm0, %v1126_v59, 0.0  ;;  %v2047_v18 = vld [vmem:[%s2006_s29 + $0x18] sm:$0xff] }
  0x27   : > { %v198_v60 = vadd.f32 %v197_v51, %v196_v50  ;;  %v605_v19 = vmul.f32 %v2047_v18, %v2047_v18 }
  0x28   : > { %v334_v11 = vadd.f32 %v333_v3, %v332_v61  ;;  %v471_v12 = vadd.f32 %v470_v4, %v469_v62 }
  0x29   : > { %v199_v63 = vrot.slane %v198_v60, 2 }
  0x2a   : > { %717 = vadd.xlane.f32.xlu1 %v716_v24  ;;  %580 = vadd.xlane.f32.xlu0 %v579_v25  ;;  %v335_v14 = vrot.slane %v334_v11, 2  ;;  %v472_v15 = vrot.slane %v471_v12, 2  ;;  %v606_v25 = vsel %vm195_vm1, %v605_v19, 0.0 }
  0x2b   : > { %v200_v10 = vadd.f32 %v199_v63, %v198_v60 }
  0x2c   : > { %v336_v21 = vadd.f32 %v335_v14, %v334_v11  ;;  %v473_v24 = vadd.f32 %v472_v15, %v471_v12 }
  0x2d   : > { %v201_v13 = vrot.slane %v200_v10, 1 }
  0x2e   : > { %720 = vadd.xlane.f32.xlu1 %v719_v30  ;;  %583 = vadd.xlane.f32.xlu0 %v582_v31  ;;  %v337_v26 = vrot.slane %v336_v21, 1  ;;  %v474_v27 = vrot.slane %v473_v24, 1  ;;  %v607_v30 = vrot.slane %v606_v25, 4 }
  0x2f   : > { %v202_v20 = vadd.f32 %v201_v13, %v200_v10 }
  0x30   : > { %v338_v31 = vadd.f32 %v337_v26, %v336_v21  ;;  %v475_v32 = vadd.f32 %v474_v27, %v473_v24  ;;  %v608_v33 = vadd.f32 %v607_v30, %v606_v25  ;;  %v2063_v25 = vld [vmem:[%s2006_s29 + $0x20] sm:$0xff]  ;;  %v2069_v27 = vld [vmem:[%s2006_s29 + $0x28] sm:$0xff] }
  0x31   : > { %1666 = vrsqrt.f32 %v202_v20  ;;  %vm205_vm2 = vcmp.eq.f32.partialorder %v202_v20, inf  ;;  %vm207_vm3 = vcmp.eq.f32.partialorder %v202_v20, 0.0 }
  0x32   : > { %991 = vadd.xlane.f32.xlu1 %v990_v36  ;;  %854 = vadd.xlane.f32.xlu0 %v853_v37  ;;  %1668 = vrsqrt.f32 %v338_v31  ;;  %v609_v36 = vrot.slane %v608_v33, 2  ;;  %vm341_vm4 = vcmp.eq.f32.partialorder %v338_v31, inf  ;;  %v344_v56 = vand.u32 2147483648, %v338_v31 }
  0x33   : > { %1670 = vrsqrt.f32 %v475_v32  ;;  %vm478_vm5 = vcmp.eq.f32.partialorder %v475_v32, inf  ;;  %vm343_vm6 = vcmp.eq.f32.partialorder %v338_v31, 0.0  ;;  %vm480_vm7 = vcmp.eq.f32.partialorder %v475_v32, 0.0 }
  0x34   : > { %v610_v37 = vadd.f32 %v609_v36, %v608_v33  ;;  %v481_v61 = vand.u32 2147483648, %v475_v32  ;;  %v2082_v33 = vld [vmem:[%s2006_s29 + $0x40] sm:$0xff] }
  0x36   : > { %994 = vadd.xlane.f32.xlu1 %v993_v45  ;;  %857 = vadd.xlane.f32.xlu0 %v856_v46  ;;  %v611_v38 = vrot.slane %v610_v37, 1  ;;  %v208_v45 = vand.u32 2147483648, %v202_v20 }
  0x38   : > { %v612_v43 = vadd.f32 %v611_v38, %v610_v37 }
  0x3a   : > { %1265 = vadd.xlane.f32.xlu1 %v1264_v57  ;;  %1128 = vadd.xlane.f32.xlu0 %v1127_v58  ;;  %1672 = vrsqrt.f32 %v612_v43  ;;  %vm615_vm8 = vcmp.eq.f32.partialorder %v612_v43, inf  ;;  %vm617_vm9 = vcmp.eq.f32.partialorder %v612_v43, 0.0 }
  0x3b   : > { %v1667_v39 = vpop.eup %1666 }
  0x3c   : > { %v204_v44 = vmul.f32 %v1667_v39, %v202_v20  ;;  %v1669_v47 = vpop.eup %1668 }
  0x3d   : > { %v1671_v51 = vpop.eup %1670  ;;  %v340_v55 = vmul.f32 %v1669_v47, %v338_v31 }
  0x3e   : > { %1268 = vadd.xlane.f32.xlu1 %v1267_v5  ;;  %1131 = vadd.xlane.f32.xlu0 %v1130_v7  ;;  %v206_v46 = vsel %vm205_vm2, %v202_v20, %v204_v44  ;;  %v477_v57 = vmul.f32 %v1671_v51, %v475_v32  ;;  %v618_v7 = vand.u32 2147483648, %v612_v43 }
  0x3f   : > { %v209_v50 = vsel %vm207_vm3, %v208_v45, %v206_v46  ;;  %v342_v58 = vsel %vm341_vm4, %v338_v31, %v340_v55  ;;  %v879_v31 = vmul.f32 %v2069_v27, %v2069_v27 }
  0x40   : > { %v210_v54 = vmax.f32 %v209_v50, 1e-12  ;;  %v345_v59 = vsel %vm343_vm6, %v344_v56, %v342_v58  ;;  %v479_v60 = vsel %vm478_vm5, %v475_v32, %v477_v57  ;;  %v2079_v32 = vld [vmem:[%s2006_s29 + $0x38] sm:$0xff] }
  0x41   : > { %v346_v62 = vmax.f32 %v345_v59, 1e-12  ;;  %v482_v63 = vsel %vm480_vm7, %v481_v61, %v479_v60  ;;  %v880_v37 = vsel %vm195_vm1, %v879_v31, 0.0  ;;  %v1153_v38 = vmul.f32 %v2079_v32, %v2079_v32 }
  0x42   : > { %1674 = vrcp.f32 %v210_v54  ;;  %v483_v3 = vmax.f32 %v482_v63, 1e-12  ;;  %v881_v44 = vrot.slane %v880_v37, 4 }
  0x43   : > { %1676 = vrcp.f32 %v346_v62  ;;  %v1154_v47 = vsel %vm195_vm1, %v1153_v38, 0.0 }
  0x44   : > { %v1673_v4 = vpop.eup %1672  ;;  %1678 = vrcp.f32 %v483_v3  ;;  %v882_v51 = vadd.f32 %v881_v44, %v880_v37  ;;  %v1155_v54 = vrot.slane %v1154_v47, 4 }
  0x45   : > { %v614_v5 = vmul.f32 %v1673_v4, %v612_v43 }
  0x46   : > { %v883_v58 = vrot.slane %v882_v51, 2  ;;  %v1156_v59 = vadd.f32 %v1155_v54, %v1154_v47 }
  0x47   : > { %v616_v10 = vsel %vm615_vm8, %v612_v43, %v614_v5  ;;  %v1290_v43 = vmul.f32 %v2082_v33, %v2082_v33 }
  0x48   : > { %v619_v11 = vsel %vm617_vm9, %v618_v7, %v616_v10  ;;  %v884_v63 = vadd.f32 %v883_v58, %v882_v51  ;;  %v1157_v3 = vrot.slane %v1156_v59, 2 }
  0x49   : > { %v620_v13 = vmax.f32 %v619_v11, 1e-12  ;;  %v1291_v50 = vsel %vm195_vm1, %v1290_v43, 0.0 }
  0x4a   : > { %v1292_v57 = vrot.slane %v1291_v50, 4  ;;  %v885_v10 = vrot.slane %v884_v63, 1  ;;  %v1158_v11 = vadd.f32 %v1157_v3, %v1156_v59 }
  0x4b   : > { %1680 = vrcp.f32 %v620_v13 }
  0x4c   : > { %v1675_v12 = vpop.eup %1674  ;;  %v1293_v62 = vadd.f32 %v1292_v57, %v1291_v50 }
  0x4d   : > { %v212_v14 = vmul.f32 %v1675_v12, %v2009_v42  ;;  %v1677_v15 = vpop.eup %1676 }
  0x4e   : > { %v348_v19 = vmul.f32 %v1677_v15, %v2027_v52  ;;  %v1679_v20 = vpop.eup %1678  ;;  %v742_v52 = vmul.f32 %v2063_v25, %v2063_v25  ;;  %v1294_v7 = vrot.slane %v1293_v62, 2  ;;  %v1159_v15 = vrot.slane %v1158_v11, 1 }
  0x4f   : > { %1576 = vmatprep.subr.mxu0 %v212_v14  ;;  %v2055_v21 = vmul.f32 %v1679_v20, %v2030_v53  ;;  %v2072_v53 = vld [vmem:[%s2006_s29 + $0x30] sm:$0xff] }
  0x50   : > { %1577 = vmatpush3.msra.mxu0 %v212_v14  ;;  %1581 = vmatprep.subr.mxu1 %v348_v19  ;;  %v743_v26 = vsel %vm195_vm1, %v742_v52, 0.0  ;;  %v1295_v13 = vadd.f32 %v1294_v7, %v1293_v62  ;;  %v886_v14 = vadd.f32 %v885_v10, %v884_v63 }
  0x51   : > { %1582 = vmatpush3.msra.mxu1 %v348_v19  ;;  %1586 = vmatprep.subr.mxu0 %v2055_v21  ;;  %v744_v30 = vrot.slane %v743_v26, 4 }
  0x52   : > { %v1296_v20 = vrot.slane %v1295_v13, 1  ;;  %vm889_vm12 = vcmp.eq.f32.partialorder %v886_v14, inf  ;;  %v892_v47 = vand.u32 2147483648, %v886_v14  ;;  %vm891_vm14 = vcmp.eq.f32.partialorder %v886_v14, 0.0 }
  0x53   : > { %v745_v36 = vadd.f32 %v744_v30, %v743_v26 }
  0x54   : > { %v1297_v52 = vadd.f32 %v1296_v20, %v1295_v13 }
  0x55   : > { %v1681_v24 = vpop.eup %1680  ;;  %v746_v45 = vrot.slane %v745_v36, 2 }
  0x56   : > { %v2059_v42 = vmul.f32 %v1681_v24, %v2047_v18  ;;  %v1016_v18 = vmul.f32 %v2072_v53, %v2072_v53  ;;  %v1160_v24 = vadd.f32 %v1159_v15, %v1158_v11  ;;  %vm1300_vm3 = vcmp.eq.f32.partialorder %v1297_v52, inf }
  0x57   : > { %v747_v55 = vadd.f32 %v746_v45, %v745_v36  ;;  %v1303_v63 = vand.u32 2147483648, %v1297_v52  ;;  %vm1302_vm5 = vcmp.eq.f32.partialorder %v1297_v52, 0.0 }
  0x58   : > { %1591 = vmatprep.subr.mxu1 %v2059_v42  ;;  %v1017_v39 = vsel %vm195_vm1, %v1016_v18, 0.0  ;;  %vm1163_vm2 = vcmp.eq.f32.partialorder %v1160_v24, inf  ;;  %vm1165_vm4 = vcmp.eq.f32.partialorder %v1160_v24, 0.0 }
  0x59   : > { %v1018_v46 = vrot.slane %v1017_v39, 4  ;;  %v748_v60 = vrot.slane %v747_v55, 1 }
  0x5b   : > { %v1019_v56 = vadd.f32 %v1018_v46, %v1017_v39  ;;  %v749_v4 = vadd.f32 %v748_v60, %v747_v55  ;;  %v1166_v60 = vand.u32 2147483648, %v1160_v24 }
  0x5d   : > { %v1020_v61 = vrot.slane %v1019_v56, 2  ;;  %1682 = vrsqrt.f32 %v749_v4  ;;  %vm752_vm10 = vcmp.eq.f32.partialorder %v749_v4, inf  ;;  %v755_v31 = vand.u32 2147483648, %v749_v4 }
  0x5e   : > { %1684 = vrsqrt.f32 %v886_v14  ;;  %vm754_vm11 = vcmp.eq.f32.partialorder %v749_v4, 0.0 }
  0x5f   : > { %v1021_v5 = vadd.f32 %v1020_v61, %v1019_v56 }
  0x61   : > { %v1022_v12 = vrot.slane %v1021_v5, 1 }
  0x63   : > { %v1023_v19 = vadd.f32 %v1022_v12, %v1021_v5 }
  0x65   : > { %1686 = vrsqrt.f32 %v1023_v19  ;;  %vm1026_vm13 = vcmp.eq.f32.partialorder %v1023_v19, inf  ;;  %v1029_v51 = vand.u32 2147483648, %v1023_v19  ;;  %vm1028_vm15 = vcmp.eq.f32.partialorder %v1023_v19, 0.0 }
  0x66   : > { %1688 = vrsqrt.f32 %v1160_v24 }
  0x67   : > { %v1683_v26 = vpop.eup %1682  ;;  %1690 = vrsqrt.f32 %v1297_v52 }
  0x68   : > { %v751_v30 = vmul.f32 %v1683_v26, %v749_v4  ;;  %v1685_v18 = vpop.eup %1684 }
  0x69   : > { %v888_v39 = vmul.f32 %v1685_v18, %v886_v14 }
  0x6a   : > { %v753_v36 = vsel %vm752_vm10, %v749_v4, %v751_v30 }
  0x6b   : > { %v756_v38 = vsel %vm754_vm11, %v755_v31, %v753_v36  ;;  %v890_v50 = vsel %vm889_vm12, %v886_v14, %v888_v39 }
  0x6c   : > { %v757_v46 = vmax.f32 %v756_v38, 1e-12  ;;  %v893_v59 = vsel %vm891_vm14, %v892_v47, %v890_v50 }
  0x6d   : > { %v894_v4 = vmax.f32 %v893_v59, 1e-12 }
  0x6e   : > { %1692 = vrcp.f32 %v757_v46 }
  0x6f   : > { %v1687_v37 = vpop.eup %1686 }
  0x70   : > { %v1689_v43 = vpop.eup %1688  ;;  %v1025_v44 = vmul.f32 %v1687_v37, %v1023_v19 }
  0x71   : > { %v1691_v45 = vpop.eup %1690  ;;  %v1162_v54 = vmul.f32 %v1689_v43, %v1160_v24 }
  0x72   : > { %v1027_v55 = vsel %vm1026_vm13, %v1023_v19, %v1025_v44  ;;  %v1299_v56 = vmul.f32 %v1691_v45, %v1297_v52 }
  0x73   : > { %v1030_v61 = vsel %vm1028_vm15, %v1029_v51, %v1027_v55  ;;  %v1164_v62 = vsel %vm1163_vm2, %v1160_v24, %v1162_v54 }
  0x74   : > { %v1301_v3 = vsel %vm1300_vm3, %v1297_v52, %v1299_v56  ;;  %v1031_v10 = vmax.f32 %v1030_v61, 1e-12  ;;  %v1167_v11 = vsel %vm1165_vm4, %v1166_v60, %v1164_v62 }
  0x75   : > { %v1304_v12 = vsel %vm1302_vm5, %v1303_v63, %v1301_v3  ;;  %v1168_v13 = vmax.f32 %v1167_v11, 1e-12 }
  0x76   : > { %v1305_v19 = vmax.f32 %v1304_v12, 1e-12 }
  0x78   : > { %v2107_v20 = vpop.eup %1692 }
  0xab   : > { %v2092_v57 = vpop.xlane.xlu1 %306  ;;  %v2094_v58 = vpop.xlane.xlu0 %169 }
  0xac   : > { %1694 = vrsqrt.f32 %v2092_v57  ;;  %vm313_vm6 = vcmp.eq.f32.partialorder %v2092_v57, inf  ;;  %v316_v30 = vand.u32 2147483648, %v2092_v57  ;;  %vm176_vm7 = vcmp.eq.f32.partialorder %v2094_v58, inf }
  0xad   : > { %1696 = vrsqrt.f32 %v2094_v58  ;;  %v179_v31 = vand.u32 2147483648, %v2094_v58  ;;  %vm315_vm8 = vcmp.eq.f32.partialorder %v2092_v57, 0.0  ;;  %vm178_vm14 = vcmp.eq.f32.partialorder %v2094_v58, 0.0 }
  0xaf   : > { %v444_v5 = vpop.xlane.xlu1 %443  ;;  %v2098_v7 = vpop.xlane.xlu0 %172 }
  0xb0   : > { %1698 = vrsqrt.f32 %v444_v5  ;;  %vm450_vm9 = vcmp.eq.f32.partialorder %v444_v5, inf  ;;  %vm452_vm10 = vcmp.eq.f32.partialorder %v444_v5, 0.0  ;;  %v453_v36 = vand.u32 2147483648, %v444_v5 }
  0xb1   : > { %1700 = vrsqrt.f32 %v2098_v7  ;;  %vm183_vm11 = vcmp.eq.f32.partialorder %v2098_v7, inf  ;;  %vm185_vm12 = vcmp.eq.f32.partialorder %v2098_v7, 0.0  ;;  %v186_v38 = vand.u32 2147483648, %v2098_v7 }
  0xb2   : > { %1702 = vrcp.f32 %v894_v4 }
  0xb3   : > { %v2101_v14 = vpop.xlane.xlu1 %446  ;;  %v2103_v15 = vpop.xlane.xlu0 %309  ;;  %1704 = vrcp.f32 %v1031_v10 }
  0xb4   : > { %1706 = vrsqrt.f32 %v2101_v14  ;;  %vm457_vm13 = vcmp.eq.f32.partialorder %v2101_v14, inf  ;;  %vm459_vm15 = vcmp.eq.f32.partialorder %v2101_v14, 0.0  ;;  %v460_v45 = vand.u32 2147483648, %v2101_v14 }
  0xb5   : > { %1708 = vrsqrt.f32 %v2103_v15  ;;  %vm320_vm2 = vcmp.eq.f32.partialorder %v2103_v15, inf  ;;  %vm322_vm3 = vcmp.eq.f32.partialorder %v2103_v15, 0.0  ;;  %v323_v59 = vand.u32 2147483648, %v2103_v15 }
  0xb6   : > { %1710 = vrcp.f32 %v1168_v13  ;;  %v1695_v26 = vpop.eup %1694 }
  0xb7   : > { %v2110_v24 = vpop.xlane.xlu1 %717  ;;  %v2112_v52 = vpop.xlane.xlu0 %580  ;;  %1712 = vrcp.f32 %v1305_v19  ;;  %v312_v43 = vmul.f32 %v1695_v26, %v2092_v57 }
  0xb8   : > { %1714 = vrsqrt.f32 %v2110_v24  ;;  %v1697_v18 = vpop.eup %1696  ;;  %vm724_vm4 = vcmp.eq.f32.partialorder %v2110_v24, inf  ;;  %vm726_vm5 = vcmp.eq.f32.partialorder %v2110_v24, 0.0 }
  0xb9   : > { %1716 = vrsqrt.f32 %v2112_v52  ;;  %v175_v55 = vmul.f32 %v1697_v18, %v2094_v58  ;;  %v314_v3 = vsel %vm313_vm6, %v2092_v57, %v312_v43  ;;  %vm589_vm6 = vcmp.eq.f32.partialorder %v2112_v52, 0.0 }
  0xba   : > { %v1699_v37 = vpop.eup %1698 }
  0xbb   : > { %v1701_v39 = vpop.eup %1700  ;;  %v449_v44 = vmul.f32 %v1699_v37, %v444_v5  ;;  %v2128_v46 = vpop.xlane.xlu1 %720 }
  0xbc   : > { %v2130_v47 = vpop.xlane.xlu0 %583  ;;  %v2132_v50 = vpop.eup %1702  ;;  %v182_v51 = vmul.f32 %v1701_v39, %v2098_v7  ;;  %1718 = vrsqrt.f32 %v2128_v46 }
  0xbd   : > { %v2138_v54 = vpop.eup %1704  ;;  %v451_v56 = vsel %vm450_vm9, %v444_v5, %v449_v44  ;;  %1720 = vrsqrt.f32 %v2130_v47  ;;  %v727_v5 = vand.u32 2147483648, %v2110_v24  ;;  %vm587_vm9 = vcmp.eq.f32.partialorder %v2112_v52, inf }
  0xbe   : > { %v1707_v60 = vpop.eup %1706  ;;  %v454_v61 = vsel %vm452_vm10, %v453_v36, %v451_v56  ;;  %v184_v62 = vsel %vm183_vm11, %v2098_v7, %v182_v51  ;;  %v177_v7 = vsel %vm176_vm7, %v2094_v58, %v175_v55  ;;  %v590_v44 = vand.u32 2147483648, %v2112_v52 }
  0xbf   : > { %v1709_v63 = vpop.eup %1708  ;;  %v187_v4 = vsel %vm185_vm12, %v186_v38, %v184_v62  ;;  %v456_v10 = vmul.f32 %v1707_v60, %v2101_v14  ;;  %v2157_v11 = vpop.xlane.xlu1 %991  ;;  %v462_v19 = vmax.f32 %v454_v61, 1e-12  ;;  %v2183_v51 = vsel %vm315_vm8, %v316_v30, %v314_v3 }
  0xc0   : > { %v2159_v12 = vpop.xlane.xlu0 %854  ;;  %v2161_v13 = vpop.eup %1710  ;;  %v319_v26 = vmul.f32 %v1709_v63, %v2103_v15  ;;  %1722 = vrsqrt.f32 %v2157_v11  ;;  %v189_v36 = vmax.f32 %v187_v4, 1e-12  ;;  %vm731_vm7 = vcmp.eq.f32.partialorder %v2128_v46, inf }
  0xc1   : > { %v2166_v18 = vpop.eup %1712  ;;  %v458_v37 = vsel %vm457_vm13, %v2101_v14, %v456_v10  ;;  %1724 = vrsqrt.f32 %v2159_v12  ;;  %v180_v57 = vsel %vm178_vm14, %v179_v31, %v177_v7  ;;  %vm733_vm8 = vcmp.eq.f32.partialorder %v2128_v46, 0.0 }
  0xc2   : > { %v1715_v38 = vpop.eup %1714  ;;  %v461_v39 = vsel %vm459_vm15, %v460_v45, %v458_v37  ;;  %v321_v43 = vsel %vm320_vm2, %v2103_v15, %v319_v26  ;;  %1726 = vrcp.f32 %v462_v19  ;;  %v734_v58 = vand.u32 2147483648, %v2128_v46 }
  0xc3   : > { %v1717_v55 = vpop.eup %1716  ;;  %v463_v56 = vmax.f32 %v461_v39, 1e-12  ;;  %v324_v60 = vsel %vm322_vm3, %v323_v59, %v321_v43  ;;  %v723_v61 = vmul.f32 %v1715_v38, %v2110_v24  ;;  %v2189_v14 = vpop.xlane.xlu1 %994  ;;  %1728 = vrcp.f32 %v189_v36 }
  0xc4   : > { %v2191_v45 = vpop.xlane.xlu0 %857  ;;  %v586_v62 = vmul.f32 %v1717_v55, %v2112_v52  ;;  %v326_v15 = vmax.f32 %v324_v60, 1e-12  ;;  %vm594_vm10 = vcmp.eq.f32.partialorder %v2130_v47, inf  ;;  %vm596_vm11 = vcmp.eq.f32.partialorder %v2130_v47, 0.0 }
  0xc5   : > { %v725_v30 = vsel %vm724_vm4, %v2110_v24, %v723_v61  ;;  %1730 = vrcp.f32 %v463_v56  ;;  %v597_v7 = vand.u32 2147483648, %v2130_v47  ;;  %v188_v43 = vmax.f32 %v180_v57, 1e-12 }
  0xc6   : > { %v1719_v59 = vpop.eup %1718  ;;  %v728_v63 = vsel %vm726_vm5, %v727_v5, %v725_v30  ;;  %v588_v3 = vsel %vm587_vm9, %v2112_v52, %v586_v62  ;;  %1732 = vrsqrt.f32 %v2189_v14  ;;  %vm998_vm12 = vcmp.eq.f32.partialorder %v2157_v11, inf }
  0xc7   : > { %v1721_v31 = vpop.eup %1720  ;;  %v736_v4 = vmax.f32 %v728_v63, 1e-12  ;;  %v591_v10 = vsel %vm589_vm6, %v590_v44, %v588_v3  ;;  %v730_v19 = vmul.f32 %v1719_v59, %v2128_v46  ;;  %1734 = vrsqrt.f32 %v2191_v45  ;;  %v2217_v24 = vpop.xlane.xlu1 %1265 }
  0xc8   : > { %v593_v26 = vmul.f32 %v1721_v31, %v2130_v47  ;;  %1736 = vrcp.f32 %v326_v15  ;;  %v599_v5 = vmax.f32 %v591_v10, 1e-12  ;;  %v2223_v36 = vpop.xlane.xlu0 %1128  ;;  %v1001_v60 = vand.u32 2147483648, %v2157_v11 }
  0xc9   : > { %v732_v52 = vsel %vm731_vm7, %v2128_v46, %v730_v19  ;;  %1738 = vrcp.f32 %v736_v4  ;;  %v325_v61 = vmax.f32 %v2183_v51, 1e-12  ;;  %vm1000_vm13 = vcmp.eq.f32.partialorder %v2157_v11, 0.0 }
  0xca   : > { %v1723_v37 = vpop.eup %1722  ;;  %v735_v38 = vsel %vm733_vm8, %v734_v58, %v732_v52  ;;  %v595_v39 = vsel %vm594_vm10, %v2130_v47, %v593_v26  ;;  %1740 = vrsqrt.f32 %v2217_v24  ;;  %vm861_vm14 = vcmp.eq.f32.partialorder %v2159_v12, inf }
  0xcb   : > { %v737_v44 = vmax.f32 %v735_v38, 1e-12  ;;  %v598_v55 = vsel %vm596_vm11, %v597_v7, %v595_v39  ;;  %v997_v56 = vmul.f32 %v1723_v37, %v2157_v11  ;;  %1742 = vrsqrt.f32 %v2223_v36  ;;  %v1725_v62 = vpop.eup %1724  ;;  %v2241_v51 = vpop.xlane.xlu1 %1268 }
  0xcc   : > { %1744 = vrcp.f32 %v599_v5  ;;  %v600_v46 = vmax.f32 %v598_v55, 1e-12  ;;  %v2236_v57 = vpop.eup %1726  ;;  %v860_v30 = vmul.f32 %v1725_v62, %v2159_v12  ;;  %v864_v63 = vand.u32 2147483648, %v2159_v12 }
  0xcd   : > { %v999_v47 = vsel %vm998_vm12, %v2157_v11, %v997_v56  ;;  %1746 = vrcp.f32 %v737_v44  ;;  %v1729_v59 = vpop.eup %1728  ;;  %vm863_vm15 = vcmp.eq.f32.partialorder %v2159_v12, 0.0  ;;  %v2247_v11 = vpop.xlane.xlu0 %1131  ;;  %vm1005_vm2 = vcmp.eq.f32.partialorder %v2189_v14, inf }
  0xce   : > { %v1002_v15 = vsel %vm1000_vm13, %v1001_v60, %v999_v47  ;;  %1748 = vrcp.f32 %v188_v43  ;;  %v862_v58 = vsel %vm861_vm14, %v2159_v12, %v860_v30  ;;  %vm1007_vm3 = vcmp.eq.f32.partialorder %v2189_v14, 0.0 }
  0xcf   : > { %v2243_v3 = vpop.eup %1730  ;;  %1750 = vrcp.f32 %v325_v61  ;;  %v1010_v4 = vmax.f32 %v1002_v15, 1e-12  ;;  %v865_v10 = vsel %vm863_vm15, %v864_v63, %v862_v58  ;;  %v1008_v12 = vand.u32 2147483648, %v2189_v14 }
  0xd0   : > { %v1733_v31 = vpop.eup %1732  ;;  %1752 = vrcp.f32 %v600_v46  ;;  %v873_v26 = vmax.f32 %v865_v10, 1e-12  ;;  %vm868_vm4 = vcmp.eq.f32.partialorder %v2191_v45, inf  ;;  %vm870_vm5 = vcmp.eq.f32.partialorder %v2191_v45, 0.0 }
  0xd1   : > { %v1735_v19 = vpop.eup %1734  ;;  %v1004_v5 = vmul.f32 %v1733_v31, %v2189_v14  ;;  %1754 = vrsqrt.f32 %v2241_v51  ;;  %v871_v39 = vand.u32 2147483648, %v2191_v45  ;;  %vm1272_vm9 = vcmp.eq.f32.partialorder %v2217_v24, inf }
  0xd2   : > { %v1737_v52 = vpop.eup %1736  ;;  %v867_v7 = vmul.f32 %v1735_v19, %v2191_v45  ;;  %1756 = vrsqrt.f32 %v2247_v11  ;;  %vm1274_vm6 = vcmp.eq.f32.partialorder %v2217_v24, 0.0  ;;  %v1275_v47 = vand.u32 2147483648, %v2217_v24 }
  0xd3   : > { %v1739_v37 = vpop.eup %1738  ;;  %1758 = vrcp.f32 %v873_v26  ;;  %v1006_v38 = vsel %vm1005_vm2, %v2189_v14, %v1004_v5  ;;  %vm1135_vm7 = vcmp.eq.f32.partialorder %v2223_v36, inf  ;;  %vm1137_vm8 = vcmp.eq.f32.partialorder %v2223_v36, 0.0 }
  0xd4   : > { %v1741_v43 = vpop.eup %1740  ;;  %1760 = vrcp.f32 %v1010_v4  ;;  %v1009_v44 = vsel %vm1007_vm3, %v1008_v12, %v1006_v38  ;;  %v869_v55 = vsel %vm868_vm4, %v2191_v45, %v867_v7  ;;  %v1138_v63 = vand.u32 2147483648, %v2223_v36 }
  0xd5   : > { %v1743_v56 = vpop.eup %1742  ;;  %v1011_v60 = vmax.f32 %v1009_v44, 1e-12  ;;  %v872_v61 = vsel %vm870_vm5, %v871_v39, %v869_v55  ;;  %v1271_v62 = vmul.f32 %v1741_v43, %v2217_v24  ;;  %v193_v10 = vmul.f32 %v1729_v59, %v1930_v6 }
  0xd6   : > { %v1745_v46 = vpop.eup %1744  ;;  %v874_v14 = vmax.f32 %v872_v61, 1e-12  ;;  %v1134_v15 = vmul.f32 %v1743_v56, %v2223_v36  ;;  %v465_v7 = vmul.f32 %v2236_v57, %v1921_v2  ;;  %v330_v43 = vmul.f32 %v1737_v52, %v1938_v9 }
  0xd7   : > { %v1747_v30 = vpop.eup %1746  ;;  %1762 = vrcp.f32 %v1011_v60  ;;  %v1273_v45 = vsel %vm1272_vm9, %v2217_v24, %v1271_v62  ;;  %v759_v44 = vmul.f32 %v2107_v20, %v2063_v25  ;;  %v602_v6 = vmul.f32 %v1745_v46, %v1952_v17 }
  0xd8   : > { %v1749_v58 = vpop.eup %1748  ;;  %1764 = vrcp.f32 %v874_v14  ;;  %v1276_v31 = vsel %vm1274_vm6, %v1275_v47, %v1273_v45  ;;  %v1136_v4 = vsel %vm1135_vm7, %v2223_v36, %v1134_v15  ;;  %v1033_v2 = vmul.f32 %v2138_v54, %v2072_v53 }
  0xd9   : > { %v1751_v19 = vpop.eup %1750  ;;  %v1284_v26 = vmax.f32 %v1276_v31, 1e-12  ;;  %v1139_v5 = vsel %vm1137_vm8, %v1138_v63, %v1136_v4  ;;  %v191_v12 = vmul.f32 %v1749_v58, %v1918_v1  ;;  %v896_v1 = vmul.f32 %v2132_v50, %v2069_v27 }
  0xda   : > { %v1753_v24 = vpop.eup %1752  ;;  %v1147_v38 = vmax.f32 %v1139_v5, 1e-12  ;;  %v328_v39 = vmul.f32 %v1751_v19, %v1915_v0  ;;  %vm1279_vm10 = vcmp.eq.f32.partialorder %v2241_v51, inf  ;;  %v467_v9 = vmul.f32 %v2243_v3, %v1935_v8 }
  0xdb   : > { %v1755_v36 = vpop.eup %1754  ;;  %1766 = vrcp.f32 %v1284_v26  ;;  %1578 = vmatprep.mubr.msk.f32.mxu0 %vm167_vm0, %v191_v12  ;;  %vm1281_vm11 = vcmp.eq.f32.partialorder %v2241_v51, 0.0  ;;  %v1282_v25 = vand.u32 2147483648, %v2241_v51  ;;  %v739_v53 = vmul.f32 %v1739_v37, %v1949_v16 }
  0xdc   : > { %v1757_v57 = vpop.eup %1756  ;;  %1768 = vrcp.f32 %v1147_v38  ;;  %1583 = vmatprep.mubr.msk.f32.mxu1 %vm167_vm0, %v328_v39  ;;  %v1278_v0 = vmul.f32 %v1755_v36, %v2241_v51  ;;  %1579 = vmatmul.mubr.msk.f32.vlgmr.msra.gmra.mrb[0].mxu0 %vm167_vm0, %v193_v10  ;;  %vm1142_vm12 = vcmp.eq.f32.partialorder %v2247_v11, inf  ;;  %v1145_v8 = vand.u32 2147483648, %v2247_v11 }
  0xdd   : > { %v1759_v17 = vpop.eup %1758  ;;  %v1141_v27 = vmul.f32 %v1757_v57, %v2247_v11  ;;  %1588 = vmatprep.mubr.msk.f32.mxu0 %vm167_vm0, %v465_v7  ;;  %1587 = vmatpush3.msra.mxu0 %v2055_v21  ;;  %v604_v54 = vmul.f32 %v1753_v24, %v1964_v23  ;;  %vm1144_vm13 = vcmp.eq.f32.partialorder %v2247_v11, 0.0  ;;  %v741_v52 = vmul.f32 %v1747_v30, %v1961_v22 }
  0xde   : > { %v1761_v20 = vpop.eup %1760  ;;  %v1280_v50 = vsel %vm1279_vm10, %v2241_v51, %v1278_v0  ;;  %1584 = vmatmul.mubr.msk.f32.vlgmr.msra.gmra.mrb[0].mxu1 %vm167_vm0, %v330_v43  ;;  %1596 = vmatprep.subr.mxu0 %v759_v44  ;;  %v876_v16 = vmul.f32 %v1759_v17, %v1976_v29  ;;  %v1170_v23 = vmul.f32 %v2161_v13, %v2079_v32 }
  0xdf   : > { %v1283_v59 = vsel %vm1281_vm11, %v1282_v25, %v1280_v50  ;;  %v1143_v3 = vsel %vm1142_vm12, %v2247_v11, %v1141_v27  ;;  %1593 = vmatprep.mubr.msk.f32.mxu1 %vm167_vm0, %v602_v6  ;;  %1592 = vmatpush3.msra.mxu1 %v2059_v42  ;;  %v1013_v11 = vmul.f32 %v1761_v20, %v1973_v28 }
  0xe0   : > { %v1285_v21 = vmax.f32 %v1283_v59, 1e-12  ;;  %v1146_v51 = vsel %vm1144_vm13, %v1145_v8, %v1143_v3  ;;  %1589 = vmatmul.mubr.msk.f32.vlgmr.msra.gmra.mrb[2].mxu0 %vm167_vm0, %v467_v9  ;;  %1601 = vmatprep.subr.mxu1 %v896_v1  ;;  %v1307_v29 = vmul.f32 %v2166_v18, %v2082_v33 }
  0xe1   : > { %v1763_v37 = vpop.eup %1762  ;;  %v1148_v55 = vmax.f32 %v1146_v51, 1e-12  ;;  %1598 = vmatprep.mubr.msk.f32.mxu0 %vm167_vm0, %v739_v53  ;;  %1597 = vmatpush3.msra.mxu0 %v759_v44 }
  0xe2   : > { %v1765_v42 = vpop.eup %1764  ;;  %1770 = vrcp.f32 %v1285_v21  ;;  %1594 = vmatmul.mubr.msk.f32.vlgmr.msra.gmra.mrb[2].mxu1 %vm167_vm0, %v604_v54  ;;  %1606 = vmatprep.subr.mxu0 %v1033_v2  ;;  %v1015_v32 = vmul.f32 %v1763_v37, %v1985_v34 }
  0xe3   : > { %1772 = vrcp.f32 %v1148_v55  ;;  %1603 = vmatprep.mubr.msk.f32.mxu1 %vm167_vm0, %v876_v16  ;;  %1602 = vmatpush3.msra.mxu1 %v896_v1  ;;  %v878_v22 = vmul.f32 %v1765_v42, %v1988_v35 }
  0xe4   : > { %1599 = vmatmul.mubr.msk.f32.vlgmr.msra.gmra.mrb[4].mxu0 %vm167_vm0, %v741_v52  ;;  %1611 = vmatprep.subr.mxu1 %v1170_v23 }
  0xe5   : > { %v1767_v28 = vpop.eup %1766  ;;  %1608 = vmatprep.mubr.msk.f32.mxu0 %vm167_vm0, %v1013_v11  ;;  %1607 = vmatpush3.msra.mxu0 %v1033_v2 }
  0xe6   : > { %v1769_v13 = vpop.eup %1768  ;;  %1604 = vmatmul.mubr.msk.f32.vlgmr.msra.gmra.mrb[4].mxu1 %vm167_vm0, %v878_v22  ;;  %1616 = vmatprep.subr.mxu0 %v1307_v29  ;;  %v1287_v33 = vmul.f32 %v1767_v28, %v1998_v40 }
  0xe7   : > { %1612 = vmatpush3.msra.mxu1 %v1170_v23  ;;  %v1150_v35 = vmul.f32 %v1769_v13, %v2001_v41 }
  0xe8   : > { %1609 = vmatmul.mubr.msk.f32.vlgmr.msra.gmra.mrb[6].mxu0 %vm167_vm0, %v1015_v32 }
  0xe9   : > { %1613 = vmatprep.mubr.msk.f32.mxu1 %vm167_vm0, %v1150_v35  ;;  %1617 = vmatpush3.msra.mxu0 %v1307_v29 }
  0xea   : > { %1618 = vmatprep.mubr.msk.f32.mxu0 %vm167_vm0, %v1287_v33 }
  0xec   : > { %v1771_v34 = vpop.eup %1770 }
  0xed   : > { %v1773_v18 = vpop.eup %1772  ;;  %v1289_v56 = vmul.f32 %v1771_v34, %v2020_v48 }
  0xee   : > { %v1152_v60 = vmul.f32 %v1773_v18, %v2023_v49 }
  0xef   : > { %1619 = vmatmul.mubr.msk.f32.vlgmr.msra.gmra.mrb[8].mxu0 %vm167_vm0, %v1289_v56 }
  0xf0   : > { %1614 = vmatmul.mubr.msk.f32.vlgmr.msra.gmra.mrb[6].mxu1 %vm167_vm0, %v1152_v60 }
 0x1af   : > { %v1580_v40 = vpop.f32.mrb[0].mxu0 }
 0x1b0   : > { %v295_v41 = vmax.f32 %v1580_v40, 0.0  ;;  %v285_v61 = vpop.f32.mrb[1].mxu0 }
 0x1b1   : > { %v294_v62 = vmax.f32 %v285_v61, 0.0  ;;  %v1585_v46 = vpop.f32.mrb[0].mxu1 }
 0x1b2   : > { %297 = vst.msk [vmem:[%s2334_s4 + $0x8] sm:$0xff] %vm195_vm1, %v295_v41  ;;  %v431_v48 = vmax.f32 %v1585_v46, 0.0  ;;  %v421_v49 = vpop.f32.mrb[1].mxu1 }
 0x1b3   : > { %296 = vst.msk [vmem:[%s2334_s4] sm:$0xff] %vm195_vm1, %v294_v62  ;;  %v1590_v14 = vpop.f32.mrb[2].mxu0  ;;  %v430_v47 = vmax.f32 %v421_v49, 0.0 }
 0x1b4   : > { %1496 = vst.msk [vmem:[%s2334_s4 + $0x18] sm:$0xff] %vm195_vm1, %v431_v48  ;;  %v568_v15 = vmax.f32 %v1590_v14, 0.0  ;;  %v558_v30 = vpop.f32.mrb[3].mxu0 }
 0x1b5   : > { %1495 = vst.msk [vmem:[%s2334_s4 + $0x10] sm:$0xff] %vm195_vm1, %v430_v47  ;;  %v567_v45 = vmax.f32 %v558_v30, 0.0  ;;  %v1595_v63 = vpop.f32.mrb[2].mxu1 }
 0x1b6   : > { %1503 = vst.msk [vmem:[%s2334_s4 + $0x28] sm:$0xff] %vm195_vm1, %v568_v15  ;;  %v705_v58 = vmax.f32 %v1595_v63, 0.0  ;;  %v695_v31 = vpop.f32.mrb[3].mxu1 }
 0x1b7   : > { %1502 = vst.msk [vmem:[%s2334_s4 + $0x20] sm:$0xff] %vm195_vm1, %v567_v45  ;;  %v1600_v4 = vpop.f32.mrb[4].mxu0  ;;  %v704_v10 = vmax.f32 %v695_v31, 0.0 }
 0x1b8   : > { %1510 = vst.msk [vmem:[%s2334_s4 + $0x38] sm:$0xff] %vm195_vm1, %v705_v58  ;;  %v842_v19 = vmax.f32 %v1600_v4, 0.0  ;;  %v832_v26 = vpop.f32.mrb[5].mxu0 }
 0x1b9   : > { %1509 = vst.msk [vmem:[%s2334_s4 + $0x30] sm:$0xff] %vm195_vm1, %v704_v10  ;;  %v841_v5 = vmax.f32 %v832_v26, 0.0  ;;  %v1605_v12 = vpop.f32.mrb[4].mxu1 }
 0x1ba   : > { %1517 = vst.msk [vmem:[%s2334_s4 + $0x48] sm:$0xff] %vm195_vm1, %v842_v19  ;;  %v979_v7 = vmax.f32 %v1605_v12, 0.0  ;;  %v969_v24 = vpop.f32.mrb[5].mxu1 }
 0x1bb   : > { %1516 = vst.msk [vmem:[%s2334_s4 + $0x40] sm:$0xff] %vm195_vm1, %v841_v5  ;;  %v1610_v38 = vpop.f32.mrb[6].mxu0  ;;  %v978_v39 = vmax.f32 %v969_v24, 0.0 }
 0x1bc   : > { %1524 = vst.msk [vmem:[%s2334_s4 + $0x58] sm:$0xff] %vm195_vm1, %v979_v7  ;;  %v1116_v43 = vmax.f32 %v1610_v38, 0.0  ;;  %v1106_v44 = vpop.f32.mrb[7].mxu0 }
 0x1bd   : > { %1523 = vst.msk [vmem:[%s2334_s4 + $0x50] sm:$0xff] %vm195_vm1, %v978_v39  ;;  %v1115_v36 = vmax.f32 %v1106_v44, 0.0 }
 0x1be   : > { %1531 = vst.msk [vmem:[%s2334_s4 + $0x68] sm:$0xff] %vm195_vm1, %v1116_v43 }
 0x1bf   : > { %1530 = vst.msk [vmem:[%s2334_s4 + $0x60] sm:$0xff] %vm195_vm1, %v1115_v36 }
 0x1c2   : > { %v1620_v6 = vpop.f32.mrb[8].mxu0 }
 0x1c3   : > { %v1615_v1 = vpop.f32.mrb[6].mxu1  ;;  %v1390_v2 = vmax.f32 %v1620_v6, 0.0  ;;  %v1380_v57 = vpop.f32.mrb[9].mxu0 }
 0x1c4   : > { %v1253_v0 = vmax.f32 %v1615_v1, 0.0  ;;  %v1243_v9 = vpop.f32.mrb[7].mxu1  ;;  %v1389_v17 = vmax.f32 %v1380_v57, 0.0 }
 0x1c5   : > { %1545 = vst.msk [vmem:[%s2334_s4 + $0x88] sm:$0xff] %vm195_vm1, %v1390_v2  ;;  %v1252_v25 = vmax.f32 %v1243_v9, 0.0 }
 0x1c6   : > { %1538 = vst.msk [vmem:[%s2334_s4 + $0x78] sm:$0xff] %vm195_vm1, %v1253_v0  ;;  %1544 = vst.msk [vmem:[%s2334_s4 + $0x80] sm:$0xff] %vm195_vm1, %v1389_v17 }
 0x1c7   : > { %1537 = vst.msk [vmem:[%s2334_s4 + $0x70] sm:$0xff] %vm195_vm1, %v1252_v25 }
 0x1c8   : > { %1787 = shalt.err (!%p1784_p3)
}
 0x1c9   : > { %s1788_s23 = scalar_lea.hbm %s2373_s13, 2304  ;;  %s1792_s26 = scalar_lea.hbm %s2426_s2, 4608 }
 0x1ca   : > { %p1789_p4 = scmp.ne.s32.totalorder %s2373_s13, %s1788_s23  ;;  %p1793_p9 = scmp.lt.u32.totalorder %s2373_s13, %s2426_s2 }
 0x1cb   : > { %p1794_p10 = scmp.lt.u32.totalorder %s1792_s26, %s1788_s23  ;;  %p1796_p12 = scmp.lt.u32.totalorder %s1788_s23, %s2373_s13 }
 0x1cc   : > { %p1790_p7 = pnand %p1789_p4, %p1894_p5 }
 0x1cd   : > { %p1795_p11 = por %p1794_p10, %p1793_p9 }
 0x1ce   : > { %p1791_p8 = pneg %p1790_p7 }
 0x1cf   : > { %p1797_p13 = por %p1796_p12, %p1795_p11 }
 0x1d1   : > { %p1798_p0 = pnand %p1797_p13, %p1791_p8 }
 0x1d3   : > { %1801 = shalt.err (!%p1798_p0)
}
 0x1d4   : > { %s1839_s29 = smov 128   ;;  %s1840_s30 = smov 8  }
 0x1d5   : > { %1625 = dma.vmem_to_hbm [thread:$0]  (%p1894_p5), %s2366_s6, 2304, %s2373_s13, %s2383_s14, %s1839_s29, %s1839_s29, %s1840_s30  }
 0x1d6 PF: > { %p1631_p1 = scmp.ge.s32.totalorder %s1836_s12, 2  ;;  %s1423_s3 = sand.u32 1, %s1824_s9  }
 0x1d7   : > { %s1424_s4 = scalar_lea.sflag [#allocation3], %s1423_s3 }
 0x1d8   : > { %p1628_p2 = pnand %p1631_p1, %p1898_p6 }
 0x1da   : > { %1819 = dma.done.wait (!%p1628_p2), %s1424_s4, 2304  }
 0x1db   : > { %1821 = vsyncadd (!%p1628_p2), %s1424_s4, 4294964992  ;;  %p12_p3 = scmp.ge.s32.totalorder %s1881_s15, 4   ;;  %s2429_s9 = smov %s1828_s10 }
 0x1dc   : > { %s2430_s10 = smov %s1832_s11  ;;  %s2431_s11 = smov %s1892_s18 }
 0x1dd   : > { %s2432_s12 = smov %s1881_s15  ;;  %14 = sbr.rel (!%p12_p3) target bundleno = 3 (0x3), region = 90 }
 0x1e4   :  { %1429 = vsyncpa [#allocation3], 1 }
 0x1e5   :  { %1431 = vsyncpa [#allocation3 + $0x1], 1 }

</bundles_post_ra>
